<compile_context>
chip_gen: v7x
topology: tpu7x:2x2x1
jax: 0.10.0
libtpu: 0.0.40
codegen_flags: <defaults>
</compile_context>

<pallas_src>
import jax
import jax.numpy as jnp
from jax.experimental import pallas as pl
from jax.experimental.pallas import tpu as pltpu


def bc_rep_kernel(x_ref, w_conv_ref, b_conv_ref,
                  w1_ref, b1_ref, w2_ref, b2_ref, act_ref):
    # x_ref      : (TB, H+2, W+2, C)  bf16   zero-padded NHWC image tile
    # w_conv_ref : (9, C, F)          bf16   3x3 taps, tap-major
    # b_conv_ref : (1, F)             f32
    # w1_ref     : (F, H1)  bf16      b1_ref : (1, H1)    f32
    # w2_ref     : (H1, A_pad) bf16   b2_ref : (1, A_pad) f32
    # act_ref    : (1, TB, A_pad)     f32
    tb, hp2, wp2, c = x_ref.shape
    h, w = hp2 - 2, wp2 - 2
    f = w_conv_ref.shape[-1]

    xp = x_ref[...]                 # bf16, MXU input path
    w_conv = w_conv_ref[...]        # (9, C, F) bf16

    # ---- encoder (reference runs it under torch.no_grad(); this kernel is
    # forward-only so the values are identical and no grad path is needed) ---
    # 3x3 / stride-1 / pad-1 conv as 9 shifted matmuls, f32 accumulation.
    acc = jnp.zeros((tb * h * w, f), jnp.float32)
    for dh in range(3):
        for dw in range(3):
            patch = xp[:, dh:dh + h, dw:dw + w, :]        # (TB, H, W, C)
            patch2d = patch.reshape(tb * h * w, c)        # fold B*P into M
            acc = acc + jnp.dot(patch2d, w_conv[dh * 3 + dw],
                                preferred_element_type=jnp.float32)
    conv = jnp.maximum(acc + b_conv_ref[...], 0.0)        # bias + ReLU (f32)
    rep = jnp.mean(conv.reshape(tb, h * w, f), axis=1)    # global avg pool

    # ---- predictor MLP ------------------------------------------------------
    hidden = jnp.dot(rep.astype(jnp.bfloat16), w1_ref[...],
                     preferred_element_type=jnp.float32) + b1_ref[...]
    hidden = jnp.maximum(hidden, 0.0)
    act = jnp.dot(hidden.astype(jnp.bfloat16), w2_ref[...],
                  preferred_element_type=jnp.float32) + b2_ref[...]
    act_ref[0] = act


def behavior_cloning_rep(x, params, *, num_actions=None, tb=None):
    """x: (B, C, H, W) float32 NCHW (PyTorch layout). Returns actions (B, A)."""
    w_conv, b_conv, w1, b1, w2, b2 = params
    B, C, H, W = x.shape
    F = w_conv.shape[-1]
    H1 = w1.shape[-1]
    A_pad = w2.shape[-1]
    A = A_pad if num_actions is None else num_actions

    # NCHW -> zero-padded NHWC, bf16 on the DMA/MXU path (halves HBM bytes).
    xp = jnp.pad(jnp.transpose(x, (0, 2, 3, 1)),
                 ((0, 0), (1, 1), (1, 1), (0, 0))).astype(jnp.bfloat16)
    Hp, Wp = H + 2, W + 2

    # Batch tile: keep the pipelined input block well under v7x's 64 MiB
    # physical / 32 MiB scoped VMEM (v5e/v6e get the same conservative tile).
    if tb is None:
        per_sample_bytes = Hp * Wp * C * 2
        tb = max(1, min(B, (4 << 20) // max(per_sample_bytes, 1)))
    grid_n = pl.cdiv(B, tb)

    x_block = (tb, Hp, Wp, C)
    x_index = lambda i: (i, 0, 0, 0)
    if grid_n >= 4:
        # deeper input pipelining only pays off with enough grid steps
        x_spec = pl.BlockSpec(x_block, x_index, pipeline_mode=pl.Buffered(3))
    else:
        x_spec = pl.BlockSpec(x_block, x_index)

    in_specs = [
        x_spec,
        pl.BlockSpec(w_conv.shape, lambda i: (0, 0, 0)),   # weights stay resident
        pl.BlockSpec(b_conv.shape, lambda i: (0, 0)),
        pl.BlockSpec(w1.shape, lambda i: (0, 0)),
        pl.BlockSpec(b1.shape, lambda i: (0, 0)),
        pl.BlockSpec(w2.shape, lambda i: (0, 0)),
        pl.BlockSpec(b2.shape, lambda i: (0, 0)),
    ]
    # 3D output so every block dim is either tiled-by-1 or equal to the full
    # array dim; last dim is lane-dense (A_pad = 128 -> unmasked stores).
    out_specs = pl.BlockSpec((1, tb, A_pad), lambda i: (i, 0, 0))
    out_shape = jax.ShapeDtypeStruct((grid_n, tb, A_pad), jnp.float32)

    flops = 2 * B * H * W * (9 * C) * F + 2 * B * (F * H1 + H1 * A_pad)
    bytes_accessed = (xp.size * 2 + (w_conv.size + w1.size + w2.size) * 2
                      + (b_conv.size + b1.size + b2.size) * 4
                      + grid_n * tb * A_pad * 4)

    out = pl.pallas_call(
        bc_rep_kernel,
        out_shape=out_shape,
        grid=(grid_n,),
        in_specs=in_specs,
        out_specs=out_specs,
        compiler_params=pltpu.CompilerParams(
            dimension_semantics=("parallel",),      # v7x: shard batch over 2 TCs
            vmem_limit_bytes=32 << 20),
        cost_estimate=pl.CostEstimate(
            flops=flops, transcendentals=0, bytes_accessed=bytes_accessed),
    )(xp, w_conv, b_conv, w1, b1, w2, b2)

    return out.reshape(grid_n * tb, A_pad)[:B, :A]


def init_params(key, C=4, F=32, H1=64, A=7, k=3, a_pad=128):
    """Deterministic synthetic parameters in kernel-friendly layouts."""
    k1, k2, k3, k4, k5, k6 = jax.random.split(key, 6)
    # torch Conv2d weight (F, C, kh, kw) -> tap-major (kh*kw, C, F), bf16
    w_conv_t = 0.1 * jax.random.normal(k1, (F, C, k, k), jnp.float32)
    w_conv = jnp.transpose(w_conv_t, (2, 3, 1, 0)).reshape(k * k, C, F)
    w_conv = w_conv.astype(jnp.bfloat16)
    b_conv = 0.01 * jax.random.normal(k2, (1, F), jnp.float32)
    w1 = (0.1 * jax.random.normal(k3, (F, H1), jnp.float32)).astype(jnp.bfloat16)
    b1 = 0.01 * jax.random.normal(k4, (1, H1), jnp.float32)
    # pad the action dim to a lane-dense width; wrapper slices back to A
    w2_raw = 0.1 * jax.random.normal(k5, (H1, A), jnp.float32)
    b2_raw = 0.01 * jax.random.normal(k6, (1, A), jnp.float32)
    w2 = jnp.zeros((H1, a_pad), jnp.float32).at[:, :A].set(w2_raw)
    w2 = w2.astype(jnp.bfloat16)
    b2 = jnp.zeros((1, a_pad), jnp.float32).at[:, :A].set(b2_raw)
    return (w_conv, b_conv, w1, b1, w2, b2)


if __name__ == "__main__":
    key = jax.random.PRNGKey(0)
    kx, kp = jax.random.split(key)
    B, C, H, W = 2, 4, 16, 16
    A = 7
    x = jax.random.normal(kx, (B, C, H, W), jnp.float32)   # NCHW, like torch
    params = init_params(kp, C=C, F=32, H1=64, A=A)

    # tb=1 exercises a multi-step grid (pipelined, parallel across TCs on v7x)
    actions = behavior_cloning_rep(x, params, num_actions=A, tb=1)
    jax.block_until_ready(actions)
    assert actions.shape == (B, A) and actions.dtype == jnp.float32
    print("KERNEL_OK")
</pallas_src>

<mosaic_0001>
module attributes {stable_mosaic.version = 11 : i64} {
  func.func @bc_rep_kernel(%arg0: i32, %arg1: memref<1x18x18x4xbf16, #tpu.memory_space<vmem>>, %arg2: memref<9x4x32xbf16, #tpu.memory_space<vmem>>, %arg3: memref<1x32xf32, #tpu.memory_space<vmem>>, %arg4: memref<32x64xbf16, #tpu.memory_space<vmem>>, %arg5: memref<1x64xf32, #tpu.memory_space<vmem>>, %arg6: memref<64x128xbf16, #tpu.memory_space<vmem>>, %arg7: memref<1x128xf32, #tpu.memory_space<vmem>>, %arg8: memref<1x1x128xf32, #tpu.memory_space<vmem>>) attributes {dimension_semantics = [#tpu.dimension_semantics<parallel>], iteration_bounds = array<i64: 2>, scalar_prefetch = 0 : i64, scratch_operands = 0 : i64, tpu.core_type = #tpu.core_type<tc>, window_params = [{transform_indices = @transform_0, window_bounds = array<i64: 1, 18, 18, 4>}, {pipeline_mode = #tpu.pipeline_mode<synchronous>, transform_indices = @transform_1, window_bounds = array<i64: 9, 4, 32>}, {pipeline_mode = #tpu.pipeline_mode<synchronous>, transform_indices = @transform_2, window_bounds = array<i64: 1, 32>}, {pipeline_mode = #tpu.pipeline_mode<synchronous>, transform_indices = @transform_3, window_bounds = array<i64: 32, 64>}, {pipeline_mode = #tpu.pipeline_mode<synchronous>, transform_indices = @transform_4, window_bounds = array<i64: 1, 64>}, {pipeline_mode = #tpu.pipeline_mode<synchronous>, transform_indices = @transform_5, window_bounds = array<i64: 64, 128>}, {pipeline_mode = #tpu.pipeline_mode<synchronous>, transform_indices = @transform_6, window_bounds = array<i64: 1, 128>}, {transform_indices = @transform_7, window_bounds = array<i64: 1, 1, 128>}]} {
    %c0 = arith.constant 0 : index
    %c0_0 = arith.constant 0 : index
    %c0_1 = arith.constant 0 : index
    %c0_2 = arith.constant 0 : index
    %0 = vector.load %arg1[%c0, %c0_0, %c0_1, %c0_2] : memref<1x18x18x4xbf16, #tpu.memory_space<vmem>>, vector<1x18x18x4xbf16>
    %c0_3 = arith.constant 0 : index
    %c0_4 = arith.constant 0 : index
    %c0_5 = arith.constant 0 : index
    %1 = vector.load %arg2[%c0_3, %c0_4, %c0_5] : memref<9x4x32xbf16, #tpu.memory_space<vmem>>, vector<9x4x32xbf16>
    %cst = arith.constant 0.000000e+00 : f32
    %2 = vector.broadcast %cst : f32 to vector<256x32xf32>
    %3 = vector.extract_strided_slice %0 {offsets = [0, 0, 0, 0], sizes = [1, 16, 16, 4], strides = [1, 1, 1, 1]} : vector<1x18x18x4xbf16> to vector<1x16x16x4xbf16>
    %4 = vector.shape_cast %3 : vector<1x16x16x4xbf16> to vector<256x4xbf16>
    %5 = vector.extract_strided_slice %1 {offsets = [0, 0, 0], sizes = [1, 4, 32], strides = [1, 1, 1]} : vector<9x4x32xbf16> to vector<1x4x32xbf16>
    %6 = vector.shape_cast %5 : vector<1x4x32xbf16> to vector<4x32xbf16>
    %cst_6 = arith.constant dense<0.000000e+00> : vector<256x32xf32>
    %7 = tpu.matmul %4, %6, %cst_6 {dimension_numbers = #tpu.dot_dimension_numbers<[1], [0], [0], [1], [0, 0, 1, 1], [], []>} : vector<256x4xbf16>, vector<4x32xbf16>, vector<256x32xf32> -> vector<256x32xf32>
    %8 = arith.addf %2, %7 : vector<256x32xf32>
    %9 = vector.extract_strided_slice %0 {offsets = [0, 0, 1, 0], sizes = [1, 16, 16, 4], strides = [1, 1, 1, 1]} : vector<1x18x18x4xbf16> to vector<1x16x16x4xbf16>
    %10 = vector.shape_cast %9 : vector<1x16x16x4xbf16> to vector<256x4xbf16>
    %11 = vector.extract_strided_slice %1 {offsets = [1, 0, 0], sizes = [1, 4, 32], strides = [1, 1, 1]} : vector<9x4x32xbf16> to vector<1x4x32xbf16>
    %12 = vector.shape_cast %11 : vector<1x4x32xbf16> to vector<4x32xbf16>
    %cst_7 = arith.constant dense<0.000000e+00> : vector<256x32xf32>
    %13 = tpu.matmul %10, %12, %cst_7 {dimension_numbers = #tpu.dot_dimension_numbers<[1], [0], [0], [1], [0, 0, 1, 1], [], []>} : vector<256x4xbf16>, vector<4x32xbf16>, vector<256x32xf32> -> vector<256x32xf32>
    %14 = arith.addf %8, %13 : vector<256x32xf32>
    %15 = vector.extract_strided_slice %0 {offsets = [0, 0, 2, 0], sizes = [1, 16, 16, 4], strides = [1, 1, 1, 1]} : vector<1x18x18x4xbf16> to vector<1x16x16x4xbf16>
    %16 = vector.shape_cast %15 : vector<1x16x16x4xbf16> to vector<256x4xbf16>
    %17 = vector.extract_strided_slice %1 {offsets = [2, 0, 0], sizes = [1, 4, 32], strides = [1, 1, 1]} : vector<9x4x32xbf16> to vector<1x4x32xbf16>
    %18 = vector.shape_cast %17 : vector<1x4x32xbf16> to vector<4x32xbf16>
    %cst_8 = arith.constant dense<0.000000e+00> : vector<256x32xf32>
    %19 = tpu.matmul %16, %18, %cst_8 {dimension_numbers = #tpu.dot_dimension_numbers<[1], [0], [0], [1], [0, 0, 1, 1], [], []>} : vector<256x4xbf16>, vector<4x32xbf16>, vector<256x32xf32> -> vector<256x32xf32>
    %20 = arith.addf %14, %19 : vector<256x32xf32>
    %21 = vector.extract_strided_slice %0 {offsets = [0, 1, 0, 0], sizes = [1, 16, 16, 4], strides = [1, 1, 1, 1]} : vector<1x18x18x4xbf16> to vector<1x16x16x4xbf16>
    %22 = vector.shape_cast %21 : vector<1x16x16x4xbf16> to vector<256x4xbf16>
    %23 = vector.extract_strided_slice %1 {offsets = [3, 0, 0], sizes = [1, 4, 32], strides = [1, 1, 1]} : vector<9x4x32xbf16> to vector<1x4x32xbf16>
    %24 = vector.shape_cast %23 : vector<1x4x32xbf16> to vector<4x32xbf16>
    %cst_9 = arith.constant dense<0.000000e+00> : vector<256x32xf32>
    %25 = tpu.matmul %22, %24, %cst_9 {dimension_numbers = #tpu.dot_dimension_numbers<[1], [0], [0], [1], [0, 0, 1, 1], [], []>} : vector<256x4xbf16>, vector<4x32xbf16>, vector<256x32xf32> -> vector<256x32xf32>
    %26 = arith.addf %20, %25 : vector<256x32xf32>
    %27 = vector.extract_strided_slice %0 {offsets = [0, 1, 1, 0], sizes = [1, 16, 16, 4], strides = [1, 1, 1, 1]} : vector<1x18x18x4xbf16> to vector<1x16x16x4xbf16>
    %28 = vector.shape_cast %27 : vector<1x16x16x4xbf16> to vector<256x4xbf16>
    %29 = vector.extract_strided_slice %1 {offsets = [4, 0, 0], sizes = [1, 4, 32], strides = [1, 1, 1]} : vector<9x4x32xbf16> to vector<1x4x32xbf16>
    %30 = vector.shape_cast %29 : vector<1x4x32xbf16> to vector<4x32xbf16>
    %cst_10 = arith.constant dense<0.000000e+00> : vector<256x32xf32>
    %31 = tpu.matmul %28, %30, %cst_10 {dimension_numbers = #tpu.dot_dimension_numbers<[1], [0], [0], [1], [0, 0, 1, 1], [], []>} : vector<256x4xbf16>, vector<4x32xbf16>, vector<256x32xf32> -> vector<256x32xf32>
    %32 = arith.addf %26, %31 : vector<256x32xf32>
    %33 = vector.extract_strided_slice %0 {offsets = [0, 1, 2, 0], sizes = [1, 16, 16, 4], strides = [1, 1, 1, 1]} : vector<1x18x18x4xbf16> to vector<1x16x16x4xbf16>
    %34 = vector.shape_cast %33 : vector<1x16x16x4xbf16> to vector<256x4xbf16>
    %35 = vector.extract_strided_slice %1 {offsets = [5, 0, 0], sizes = [1, 4, 32], strides = [1, 1, 1]} : vector<9x4x32xbf16> to vector<1x4x32xbf16>
    %36 = vector.shape_cast %35 : vector<1x4x32xbf16> to vector<4x32xbf16>
    %cst_11 = arith.constant dense<0.000000e+00> : vector<256x32xf32>
    %37 = tpu.matmul %34, %36, %cst_11 {dimension_numbers = #tpu.dot_dimension_numbers<[1], [0], [0], [1], [0, 0, 1, 1], [], []>} : vector<256x4xbf16>, vector<4x32xbf16>, vector<256x32xf32> -> vector<256x32xf32>
    %38 = arith.addf %32, %37 : vector<256x32xf32>
    %39 = vector.extract_strided_slice %0 {offsets = [0, 2, 0, 0], sizes = [1, 16, 16, 4], strides = [1, 1, 1, 1]} : vector<1x18x18x4xbf16> to vector<1x16x16x4xbf16>
    %40 = vector.shape_cast %39 : vector<1x16x16x4xbf16> to vector<256x4xbf16>
    %41 = vector.extract_strided_slice %1 {offsets = [6, 0, 0], sizes = [1, 4, 32], strides = [1, 1, 1]} : vector<9x4x32xbf16> to vector<1x4x32xbf16>
    %42 = vector.shape_cast %41 : vector<1x4x32xbf16> to vector<4x32xbf16>
    %cst_12 = arith.constant dense<0.000000e+00> : vector<256x32xf32>
    %43 = tpu.matmul %40, %42, %cst_12 {dimension_numbers = #tpu.dot_dimension_numbers<[1], [0], [0], [1], [0, 0, 1, 1], [], []>} : vector<256x4xbf16>, vector<4x32xbf16>, vector<256x32xf32> -> vector<256x32xf32>
    %44 = arith.addf %38, %43 : vector<256x32xf32>
    %45 = vector.extract_strided_slice %0 {offsets = [0, 2, 1, 0], sizes = [1, 16, 16, 4], strides = [1, 1, 1, 1]} : vector<1x18x18x4xbf16> to vector<1x16x16x4xbf16>
    %46 = vector.shape_cast %45 : vector<1x16x16x4xbf16> to vector<256x4xbf16>
    %47 = vector.extract_strided_slice %1 {offsets = [7, 0, 0], sizes = [1, 4, 32], strides = [1, 1, 1]} : vector<9x4x32xbf16> to vector<1x4x32xbf16>
    %48 = vector.shape_cast %47 : vector<1x4x32xbf16> to vector<4x32xbf16>
    %cst_13 = arith.constant dense<0.000000e+00> : vector<256x32xf32>
    %49 = tpu.matmul %46, %48, %cst_13 {dimension_numbers = #tpu.dot_dimension_numbers<[1], [0], [0], [1], [0, 0, 1, 1], [], []>} : vector<256x4xbf16>, vector<4x32xbf16>, vector<256x32xf32> -> vector<256x32xf32>
    %50 = arith.addf %44, %49 : vector<256x32xf32>
    %51 = vector.extract_strided_slice %0 {offsets = [0, 2, 2, 0], sizes = [1, 16, 16, 4], strides = [1, 1, 1, 1]} : vector<1x18x18x4xbf16> to vector<1x16x16x4xbf16>
    %52 = vector.shape_cast %51 : vector<1x16x16x4xbf16> to vector<256x4xbf16>
    %53 = vector.extract_strided_slice %1 {offsets = [8, 0, 0], sizes = [1, 4, 32], strides = [1, 1, 1]} : vector<9x4x32xbf16> to vector<1x4x32xbf16>
    %54 = vector.shape_cast %53 : vector<1x4x32xbf16> to vector<4x32xbf16>
    %cst_14 = arith.constant dense<0.000000e+00> : vector<256x32xf32>
    %55 = tpu.matmul %52, %54, %cst_14 {dimension_numbers = #tpu.dot_dimension_numbers<[1], [0], [0], [1], [0, 0, 1, 1], [], []>} : vector<256x4xbf16>, vector<4x32xbf16>, vector<256x32xf32> -> vector<256x32xf32>
    %56 = arith.addf %50, %55 : vector<256x32xf32>
    %c0_15 = arith.constant 0 : index
    %c0_16 = arith.constant 0 : index
    %57 = vector.load %arg3[%c0_15, %c0_16] : memref<1x32xf32, #tpu.memory_space<vmem>>, vector<1x32xf32>
    %58 = vector.broadcast %57 : vector<1x32xf32> to vector<256x32xf32>
    %59 = arith.addf %56, %58 : vector<256x32xf32>
    %cst_17 = arith.constant 0.000000e+00 : f32
    %60 = vector.broadcast %cst_17 : f32 to vector<256x32xf32>
    %61 = arith.maximumf %59, %60 : vector<256x32xf32>
    %62 = vector.shape_cast %61 : vector<256x32xf32> to vector<1x256x32xf32>
    %cst_18 = arith.constant dense<0.000000e+00> : vector<1x32xf32>
    %63 = vector.multi_reduction <add>, %62, %cst_18 [1] : vector<1x256x32xf32> to vector<1x32xf32>
    %cst_19 = arith.constant 2.560000e+02 : f32
    %64 = vector.broadcast %cst_19 : f32 to vector<1x32xf32>
    %65 = arith.divf %63, %64 : vector<1x32xf32>
    %66 = arith.truncf %65 : vector<1x32xf32> to vector<1x32xbf16>
    %c0_20 = arith.constant 0 : index
    %c0_21 = arith.constant 0 : index
    %67 = vector.load %arg4[%c0_20, %c0_21] : memref<32x64xbf16, #tpu.memory_space<vmem>>, vector<32x64xbf16>
    %cst_22 = arith.constant dense<0.000000e+00> : vector<1x64xf32>
    %68 = tpu.matmul %66, %67, %cst_22 {dimension_numbers = #tpu.dot_dimension_numbers<[1], [0], [0], [1], [0, 0, 1, 1], [], []>} : vector<1x32xbf16>, vector<32x64xbf16>, vector<1x64xf32> -> vector<1x64xf32>
    %c0_23 = arith.constant 0 : index
    %c0_24 = arith.constant 0 : index
    %69 = vector.load %arg5[%c0_23, %c0_24] : memref<1x64xf32, #tpu.memory_space<vmem>>, vector<1x64xf32>
    %70 = arith.addf %68, %69 : vector<1x64xf32>
    %cst_25 = arith.constant 0.000000e+00 : f32
    %71 = vector.broadcast %cst_25 : f32 to vector<1x64xf32>
    %72 = arith.maximumf %70, %71 : vector<1x64xf32>
    %73 = arith.truncf %72 : vector<1x64xf32> to vector<1x64xbf16>
    %c0_26 = arith.constant 0 : index
    %c0_27 = arith.constant 0 : index
    %74 = vector.load %arg6[%c0_26, %c0_27] : memref<64x128xbf16, #tpu.memory_space<vmem>>, vector<64x128xbf16>
    %cst_28 = arith.constant dense<0.000000e+00> : vector<1x128xf32>
    %75 = tpu.matmul %73, %74, %cst_28 {dimension_numbers = #tpu.dot_dimension_numbers<[1], [0], [0], [1], [0, 0, 1, 1], [], []>} : vector<1x64xbf16>, vector<64x128xbf16>, vector<1x128xf32> -> vector<1x128xf32>
    %c0_29 = arith.constant 0 : index
    %c0_30 = arith.constant 0 : index
    %76 = vector.load %arg7[%c0_29, %c0_30] : memref<1x128xf32, #tpu.memory_space<vmem>>, vector<1x128xf32>
    %77 = arith.addf %75, %76 : vector<1x128xf32>
    %c0_31 = arith.constant 0 : index
    %c0_32 = arith.constant 0 : index
    %c0_33 = arith.constant 0 : index
    %78 = vector.load %arg8[%c0_31, %c0_32, %c0_33] : memref<1x1x128xf32, #tpu.memory_space<vmem>>, vector<1x1x128xf32>
    %79 = vector.shape_cast %78 : vector<1x1x128xf32> to vector<1x128xf32>
    %80 = vector.shape_cast %77 : vector<1x128xf32> to vector<1x1x128xf32>
    tpu.vector_store %arg8[%c0_31, %c0_32, %c0_33], %80 {strides = array<i32>} : memref<1x1x128xf32, #tpu.memory_space<vmem>>, vector<1x1x128xf32>,
    return
  }
  func.func @transform_0(%arg0: i32) -> (i32, i32, i32, i32) {
    %c0_i32 = arith.constant 0 : i32
    %c0_i32_0 = arith.constant 0 : i32
    %c0_i32_1 = arith.constant 0 : i32
    %c0_i32_2 = arith.constant 0 : i32
    return %arg0, %c0_i32, %c0_i32_0, %c0_i32_1 : i32, i32, i32, i32
  }
  func.func @transform_1(%arg0: i32) -> (i32, i32, i32) {
    %c0_i32 = arith.constant 0 : i32
    %c0_i32_0 = arith.constant 0 : i32
    %c0_i32_1 = arith.constant 0 : i32
    %c0_i32_2 = arith.constant 0 : i32
    return %c0_i32, %c0_i32_0, %c0_i32_1 : i32, i32, i32
  }
  func.func @transform_2(%arg0: i32) -> (i32, i32) {
    %c0_i32 = arith.constant 0 : i32
    %c0_i32_0 = arith.constant 0 : i32
    %c0_i32_1 = arith.constant 0 : i32
    return %c0_i32, %c0_i32_0 : i32, i32
  }
  func.func @transform_3(%arg0: i32) -> (i32, i32) {
    %c0_i32 = arith.constant 0 : i32
    %c0_i32_0 = arith.constant 0 : i32
    %c0_i32_1 = arith.constant 0 : i32
    return %c0_i32, %c0_i32_0 : i32, i32
  }
  func.func @transform_4(%arg0: i32) -> (i32, i32) {
    %c0_i32 = arith.constant 0 : i32
    %c0_i32_0 = arith.constant 0 : i32
    %c0_i32_1 = arith.constant 0 : i32
    return %c0_i32, %c0_i32_0 : i32, i32
  }
  func.func @transform_5(%arg0: i32) -> (i32, i32) {
    %c0_i32 = arith.constant 0 : i32
    %c0_i32_0 = arith.constant 0 : i32
    %c0_i32_1 = arith.constant 0 : i32
    return %c0_i32, %c0_i32_0 : i32, i32
  }
  func.func @transform_6(%arg0: i32) -> (i32, i32) {
    %c0_i32 = arith.constant 0 : i32
    %c0_i32_0 = arith.constant 0 : i32
    %c0_i32_1 = arith.constant 0 : i32
    return %c0_i32, %c0_i32_0 : i32, i32
  }
  func.func @transform_7(%arg0: i32) -> (i32, i32, i32) {
    %c0_i32 = arith.constant 0 : i32
    %c0_i32_0 = arith.constant 0 : i32
    %c0_i32_1 = arith.constant 0 : i32
    return %arg0, %c0_i32, %c0_i32_0 : i32, i32, i32
  }
}

</mosaic_0001>

<bundles_post_ra>
// kernel: tpu_custom_call.1
= control target key start
LH: loop header
LB: loop body
LE: loop exit
PB: predicated region body
PF: predicated region fallthrough
CT: control target
= control target key end

     0   :  { %12 = vsyncpa [#allocation3], 0  ;;  %s5723_s0 = inlined_call_operand.vmem [shape: bf16[2,18,18,4], index: 0, kind: input, shape index: {}]   ;;  %s5724_s1 = inlined_call_operand.vmem [shape: bf16[9,4,32], index: 1, kind: input, shape index: {}]   ;;  %s5725_s2 = inlined_call_operand.vmem [shape: f32[1,32], index: 2, kind: input, shape index: {}]   ;;  %s5726_s3 = inlined_call_operand.vmem [shape: bf16[32,64], index: 3, kind: input, shape index: {}]   ;;  %s5727_s4 = inlined_call_operand.vmem [shape: f32[1,64], index: 4, kind: input, shape index: {}]   ;;  %s5728_s5 = inlined_call_operand.vmem [shape: bf16[64,128], index: 5, kind: input, shape index: {}]   ;;  %s5729_s6 = inlined_call_operand.vmem [shape: f32[1,128], index: 6, kind: input, shape index: {}]   ;;  %s5730_s7 = inlined_call_operand.hbm [shape: f32[2,1,128], index: 7, kind: output, shape index: {}]  }
   0x1   :  { %14 = vsyncpa [#allocation3 + $0x1], 0  ;;  %s4501_s24 = smov 0   ;;  %s4503_s25 = smov 0  }
   0x2   :  { %s4505_s26 = smov 0   ;;  %s4507_s27 = smov 0  }
   0x3 LB: > { %s4522_s28 = sadd.s32 4294967295, %s4456_s27   ;;  %s3336_s29 = sadd.s32 4294967294, %s4456_s27   ;;  %s4456_s27 = sphi %s4507_s27, %s5808_s27   ;;  %s4452_s26 = sphi %s4505_s26, %s5807_s26   ;;  %s4448_s25 = sphi %s4503_s25, %s5806_s25   ;;  %s4444_s24 = sphi %s4501_s24, %s5805_s24  }
   0x4   : > { %s4526_s30 = sadd.s32 1, %s4456_s27   ;;  %s179_s8 = sadd.s32 1, %s4452_s26 }
   0x5   : > { %s176_s9 = ssub.s32 %s4456_s27, %s4526_s30  ;;  %p189_p0 = scmp.ne.s32.totalorder %s4452_s26, %s4448_s25 }
   0x6   : > { %p177_p1 = scmp.eq.s32.totalorder %s176_s9, 0  ;;  %p190_p2 = scmp.eq.s32.totalorder %s4522_s28, 1 }
   0x7   : > { %p195_p3 = scmp.ne.s32.totalorder %s4448_s25, %s4444_s24  ;;  %p196_p4 = scmp.eq.s32.totalorder %s3336_s29, 1 }
   0x8   : > { %s4537_s10 = scalar_select %p177_p1, %s4452_s26, %s179_s8  }
   0x9   : > { %p4539_p5 = por %p190_p2, %p189_p0  ;;  %p4543_p6 = por %p196_p4, %p195_p3 }
   0xa   : > { %p3339_p7 = scmp.ge.s32.totalorder %s4456_s27, 1  ;;  %p240_p8 = scmp.lt.s32.totalorder %s4456_s27, 3 }
   0xc   : > { %p241_p9 = pnand %p3339_p7, %p240_p8 }
   0xe   : > { %244 = sbr.rel (%p241_p9) target bundleno = 1038 (0x40e), region = 48 }
  0x15   : > { %v335_v0 = vld [vmem:[%s5724_s1 + $0x8] sm:$0x3]  ;;  %vm824_vm0 = vcmask 1041408   ;;  %v332_v1 = vld [vmem:[%s5724_s1 + $0x2] sm:$0x3]  ;;  %p271_p10 = scmp.lt.s32.totalorder %s4522_s28, 1 }
  0x16   : > { %4318 = vmatprep.subr.msk.bf16.mxu0 %vm824_vm0, %v335_v0  ;;  %4314 = vmatprep.subr.msk.bf16.mxu1 %vm824_vm0, %v332_v1  ;;  %v4559_v2 = vsel %vm824_vm0, %v335_v0, 0  ;;  %v826_v3 = vsel %vm824_vm0, %v332_v1, 0  ;;  %v336_v4 = vld [vmem:[%s5724_s1 + $0xa] sm:$0x3]  ;;  %v331_v5 = vld [vmem:[%s5724_s1] sm:$0x3] }
  0x17   : > { %5757 = vst [vmem:[#allocation5_spill] sm:$0xff] %v4559_v2  ;;  %3867 = vmatpush3.bf16.msra.mxu0 %v4559_v2  ;;  %3731 = vmatpush3.bf16.msra.mxu1 %v826_v3  ;;  %s272_s17 = scalar_select %p271_p10, %s4522_s28, 1  ;;  %vm340_vm1 = vsmask.f32 3328  ;;  %vm341_vm2 = vsmask.f32 7440 }
  0x18   : > { %4320 = vmatprep.subr.msk.bf16.mxu0 %vm824_vm0, %v336_v4  ;;  %4315 = vmatprep.subr.msk.bf16.mxu1 %vm824_vm0, %v331_v5  ;;  %v4573_v6 = vsel %vm824_vm0, %v336_v4, 0  ;;  %v4576_v7 = vsel %vm824_vm0, %v331_v5, 0  ;;  %v4581_v8 = vld [vmem:[%s5724_s1 + $0xc] sm:$0x3]  ;;  %vm775_vm3 = vcmask 31744   ;;  %vm4622_vm4 = vmor %vm340_vm1, %vm341_vm2  ;;  %vm1297_vm5 = vcmask 1042432  }
  0x19   : > { %s4324_s22 = smul.u32 216, %s272_s17  ;;  %v4610_v20 = vsel %vm824_vm0, %v4581_v8, 0  ;;  %vm1298_vm6 = vcmask 1046532   ;;  %vm4459_vm8 = vmmov 0   ;;  %vm3055_vm9 = vcmask 261120   ;;  %s269_s9 = sand.u32 1, %s4448_s25  }
  0x1a   : > { %vm4897_vm7 = vmor %vm1297_vm5, %vm1298_vm6  ;;  %vm3223_vm10 = vcmask 523264   ;;  %s3566_s15 = sshll.u32 %s4522_s28, 4  ;;  %s270_s16 = scalar_lea.vmem [#allocation2], %s269_s9 }
  0x1b   : > { %s4586_s13 = scalar_lea.vmem %s5723_s0, %s4324_s22  ;;  %s3281_s17 = sshll.u32 %s270_s16, 4  ;;  %s5683_s17 = int_to_ptr.vmem [resolvable:$true] %s3281_s17 }
  0x1c   : > { %v4589_v9 = vld [vmem:[%s4586_s13] sm:$0xf]  ;;  %v4592_v10 = vld [vmem:[%s4586_s13 + $0x4] sm:$0xf]  ;;  %v279_v11 = vld [vmem:[%s4586_s13 + $0x8] sm:$0x1]  ;;  %s5681_s20 = scalar_lea.hbm %s5730_s7, %s3566_s15 }
  0x1d   : > { %v344_v12 = vshrl.u32 %v4589_v9, 16  ;;  %v347_v13 = vshll.u32 %v4589_v9, 16  ;;  %v353_v14 = vshll.u32 %v4592_v10, 16  ;;  %v357_v15 = vshrl.u32 %v4592_v10, 16  ;;  %v4600_v16 = vld [vmem:[%s4586_s13 + $0xc] sm:$0xf] }
  0x1e   : > { %v363_v17 = vshll.u32 %v279_v11, 16  ;;  %v4603_v18 = vld [vmem:[%s4586_s13 + $0x10] sm:$0xf]  ;;  %v4606_v19 = vld [vmem:[%s4586_s13 + $0x14] sm:$0x1]  ;;  %v368_v26 = vshrl.u32 %v4600_v16, 16 }
  0x1f   : > { %v346_v21 = vrot.slane %v344_v12, 4  ;;  %v349_v22 = vrot.slane %v347_v13, 5  ;;  %v355_v23 = vrot.slane %v353_v14, 5  ;;  %v359_v24 = vrot.slane %v357_v15, 4  ;;  %v4618_v33 = vld [vmem:[%s4586_s13 + $0x18] sm:$0xf] }
  0x20   : > { %v365_v25 = vrot.slane %v363_v17, 5  ;;  %v371_v27 = vshll.u32 %v4600_v16, 16  ;;  %v377_v28 = vshll.u32 %v4603_v18, 16  ;;  %v381_v31 = vshrl.u32 %v4603_v18, 16  ;;  %v4631_v39 = vld [vmem:[%s4586_s13 + $0x1c] sm:$0xf] }
  0x21   : > { %v350_v29 = vor.u32 %v349_v22, %v346_v21  ;;  %v360_v30 = vor.u32 %v359_v24, %v355_v23  ;;  %v387_v32 = vshll.u32 %v4606_v19, 16  ;;  %v370_v35 = vrot.slane %v368_v26, 4  ;;  %v4635_v46 = vld [vmem:[%s4586_s13 + $0x20] sm:$0x1]  ;;  %v4645_v57 = vld [vmem:[%s4586_s13 + $0x24] sm:$0xf] }
  0x22   : > { %v373_v36 = vrot.slane %v371_v27, 5  ;;  %v379_v37 = vrot.slane %v377_v28, 5  ;;  %v4628_v38 = vcombine.low %v4600_v16, %v4603_v18  ;;  %v383_v42 = vrot.slane %v381_v31, 4  ;;  %v4650_v62 = vld [vmem:[%s4586_s13 + $0x28] sm:$0xf]  ;;  %s3269_s21 = scalar_lea.sflag [#allocation3], %s269_s9 }
  0x23   : > { %v351_v40 = vrot.slane %v350_v29, 4  ;;  %v361_v41 = vrot.slane %v360_v30, 4  ;;  %v389_v43 = vrot.slane %v387_v32, 5  ;;  %v392_v47 = vshrl.u32 %v4618_v33, 16  ;;  %v4658_v4 = vld [vmem:[%s4586_s13 + $0x2c] sm:$0x1] }
  0x24   : > { %v374_v44 = vor.u32 %v373_v36, %v370_v35  ;;  %v395_v48 = vshll.u32 %v4618_v33, 16  ;;  %v384_v51 = vor.u32 %v383_v42, %v379_v37  ;;  %v401_v52 = vshll.u32 %v4631_v39, 16  ;;  %v4664_v14 = vld [vmem:[%s4586_s13 + $0x30] sm:$0xf]  ;;  %v4676_v28 = vld [vmem:[%s4586_s13 + $0x34] sm:$0xf] }
  0x25   : > { %v356_v49 = vsel %vm4622_vm4, %v351_v40, %v355_v23  ;;  %v366_v50 = vsel %vm4622_vm4, %v361_v41, %v365_v25  ;;  %v394_v55 = vrot.slane %v392_v47, 4  ;;  %v405_v60 = vshrl.u32 %v4631_v39, 16  ;;  %v4671_v23 = vld [vmem:[%s5724_s1 + $0x4] sm:$0x3]  ;;  %v4683_v32 = vld [vmem:[%s4586_s13 + $0x38] sm:$0x1] }
  0x26   : > { %v3341_v53 = vcombine.low %v356_v49, %v366_v50  ;;  %v375_v54 = vrot.slane %v374_v44, 4  ;;  %v397_v56 = vrot.slane %v395_v48, 5  ;;  %v385_v58 = vrot.slane %v384_v51, 4  ;;  %v4691_v48 = vld [vmem:[%s4586_s13 + $0x3c] sm:$0xf]  ;;  %s4394_s28 = scalar_lea.vmem %s5683_s17, 16 }
  0x27   : > { %v403_v59 = vrot.slane %v401_v52, 5  ;;  %v411_v61 = vshll.u32 %v4635_v46, 16  ;;  %v407_v11 = vrot.slane %v405_v60, 4  ;;  %v416_v13 = vshrl.u32 %v4645_v57, 16  ;;  %v4825_v1 = vld [vmem:[%s4586_s13 + $0x80] sm:$0x1]  ;;  %p4395_p11 = scmp.ne.s32.totalorder %s5683_s17, %s4394_s28 }
  0x28   : > { %3732 = vmatprep.mubr.msk.bf16.mxu1 %vm775_vm3, %v3341_v53  ;;  %v380_v63 = vsel %vm4622_vm4, %v375_v54, %v379_v37  ;;  %v398_v0 = vor.u32 %v397_v56, %v394_v55  ;;  %v390_v5 = vsel %vm4622_vm4, %v385_v58, %v389_v43  ;;  %v419_v21 = vshll.u32 %v4645_v57, 16  ;;  %s4460_s22 = smov [#allocation2]  }
  0x29   : > { %v413_v12 = vrot.slane %v411_v61, 5  ;;  %v3342_v15 = vcombine.low %v380_v63, %v390_v5  ;;  %v425_v22 = vshll.u32 %v4650_v62, 16  ;;  %v408_v24 = vor.u32 %v407_v11, %v403_v59  ;;  %v4711_v5 = vld [vmem:[%s4586_s13 + $0x44] sm:$0x1]  ;;  %p4396_p12 = pnand %p4395_p11, %p4539_p5  ;;  %s4398_s23 = sshll.u32 %s4460_s22, 4  ;;  %s4399_s23 = int_to_ptr.vmem [resolvable:$false] %s4398_s23 }
  0x2a   : > { %v399_v17 = vrot.slane %v398_v0, 4  ;;  %v418_v25 = vrot.slane %v416_v13, 4  ;;  %v429_v26 = vshrl.u32 %v4650_v62, 16  ;;  %v435_v27 = vshll.u32 %v4658_v4, 16  ;;  %v4716_v13 = vld [vmem:[%s4586_s13 + $0x48] sm:$0xf]  ;;  %p4401_p0 = scmp.lt.s32.totalorder %s5683_s17, %s4399_s23 }
  0x2b   : > { %3868 = vmatprep.mubr.msk.bf16.mxu0 %vm775_vm3, %v3342_v15  ;;  %3733 = vmatmul.mubr.msk.bf16.vlgmr.msra.gmra.mrb[0].mxu1 %vm775_vm3, %v3342_v15  ;;  %v421_v30 = vrot.slane %v419_v21, 5  ;;  %v427_v31 = vrot.slane %v425_v22, 5  ;;  %v440_v35 = vshrl.u32 %v4664_v14, 16  ;;  %v409_v36 = vrot.slane %v408_v24, 4  ;;  %v4723_v24 = vld [vmem:[%s4586_s13 + $0x4c] sm:$0xf]  ;;  %p4397_p13 = pneg %p4396_p12 }
  0x2c   : > { %v404_v29 = vsel %vm4622_vm4, %v399_v17, %v403_v59  ;;  %v431_v37 = vrot.slane %v429_v26, 4  ;;  %v437_v40 = vrot.slane %v435_v27, 5  ;;  %v443_v41 = vshll.u32 %v4664_v14, 16  ;;  %3765 = vmatpush3.bf16.msra.mxu1 %v4576_v7  ;;  %v4699_v7 = vld [vmem:[%s4586_s13 + $0x40] sm:$0xf]  ;;  %s4400_s29 = scalar_lea.vmem %s4399_s23, 32 }
  0x2d   : > { %v422_v42 = vor.u32 %v421_v30, %v418_v25  ;;  %v442_v43 = vrot.slane %v440_v35, 4  ;;  %v449_v44 = vshll.u32 %v4676_v28, 16  ;;  %v453_v47 = vshrl.u32 %v4676_v28, 16  ;;  %4316 = vmatprep.subr.msk.bf16.mxu1 %vm824_vm0, %v4671_v23  ;;  %p4402_p1 = scmp.lt.s32.totalorder %s4400_s29, %s4394_s28 }
  0x2e   : > { %v414_v49 = vsel %vm4622_vm4, %v409_v36, %v413_v12  ;;  %v432_v50 = vor.u32 %v431_v37, %v427_v31  ;;  %v445_v51 = vrot.slane %v443_v41, 5  ;;  %v459_v52 = vshll.u32 %v4683_v32, 16 }
  0x2f   : > { %v4701_v53 = vcombine.low %v404_v29, %v414_v49  ;;  %v423_v54 = vrot.slane %v422_v42, 4  ;;  %v451_v55 = vrot.slane %v449_v44, 5  ;;  %v455_v56 = vrot.slane %v453_v47, 4  ;;  %v4745_v42 = vld [vmem:[%s4586_s13 + $0x54] sm:$0xf]  ;;  %p4403_p2 = por %p4402_p1, %p4401_p0 }
  0x30   : > { %v433_v58 = vrot.slane %v432_v50, 4  ;;  %v446_v59 = vor.u32 %v445_v51, %v442_v43  ;;  %v461_v60 = vrot.slane %v459_v52, 5  ;;  %v464_v61 = vshrl.u32 %v4691_v48, 16  ;;  %v4750_v50 = vld [vmem:[%s4586_s13 + $0x58] sm:$0xf] }
  0x31   : > { %5760 = vst [vmem:[#allocation6_spill] sm:$0xff] %v4701_v53  ;;  %3869 = vmatmul.mubr.msk.bf16.vlgmr.msra.gmra.mrb[0].mxu0 %vm775_vm3, %v4701_v53  ;;  %3736 = vmatprep.mubr.msk.bf16.mxu1 %vm775_vm3, %v4701_v53  ;;  %v428_v63 = vsel %vm4622_vm4, %v423_v54, %v427_v31  ;;  %v456_v0 = vor.u32 %v455_v56, %v451_v55  ;;  %v467_v11 = vshll.u32 %v4691_v48, 16  ;;  %v473_v12 = vshll.u32 %v4699_v7, 16  ;;  %p4404_p3 = pnand %p4403_p2, %p4397_p13 }
  0x32   : > { %3901 = vmatpush3.bf16.msra.mxu0 %v4573_v6  ;;  %v438_v15 = vsel %vm4622_vm4, %v433_v58, %v437_v40  ;;  %v447_v17 = vrot.slane %v446_v59, 4  ;;  %v466_v21 = vrot.slane %v464_v61, 4  ;;  %v477_v22 = vshrl.u32 %v4699_v7, 16 }
  0x33   : > { %v4725_v25 = vcombine.low %v428_v63, %v438_v15  ;;  %v457_v26 = vrot.slane %v456_v0, 4  ;;  %v469_v27 = vrot.slane %v467_v11, 5  ;;  %v475_v29 = vrot.slane %v473_v12, 5  ;;  %4321 = vmatprep.subr.msk.bf16.mxu0 %vm824_vm0, %v4581_v8  ;;  %v4740_v8 = vld [vmem:[%s4586_s13 + $0x50] sm:$0x1] }
  0x34   : > { %v452_v6 = vsel %vm4622_vm4, %v447_v17, %v451_v55  ;;  %v479_v30 = vrot.slane %v477_v22, 4  ;;  %v483_v31 = vshll.u32 %v4711_v5, 16  ;;  %v488_v35 = vshrl.u32 %v4716_v13, 16  ;;  %v4763_v11 = vld [vmem:[%s4586_s13 + $0x5c] sm:$0x1] }
  0x35   : > { %5761 = vst [vmem:[#allocation7_spill] sm:$0xff] %v4725_v25  ;;  %3872 = vmatprep.mubr.msk.bf16.mxu0 %vm775_vm3, %v4725_v25  ;;  %3737 = vmatmul.mubr.msk.bf16.gmra.mrb[4].mxu1 %vm775_vm3, %v4725_v25  ;;  %v462_v36 = vsel %vm4622_vm4, %v457_v26, %v461_v60  ;;  %v470_v37 = vor.u32 %v469_v27, %v466_v21  ;;  %v491_v40 = vshll.u32 %v4716_v13, 16  ;;  %v497_v41 = vshll.u32 %v4723_v24, 16  ;;  %v4767_v15 = vld [vmem:[%s4586_s13 + $0x60] sm:$0xf] }
  0x36   : > { %v4747_v43 = vcombine.low %v452_v6, %v462_v36  ;;  %v480_v44 = vor.u32 %v479_v30, %v475_v29  ;;  %v485_v47 = vrot.slane %v483_v31, 5  ;;  %v490_v49 = vrot.slane %v488_v35, 4  ;;  %v4772_v27 = vld [vmem:[%s4586_s13 + $0x64] sm:$0xf] }
  0x37   : > { %v471_v51 = vrot.slane %v470_v37, 4  ;;  %v493_v52 = vrot.slane %v491_v40, 5  ;;  %v499_v54 = vrot.slane %v497_v41, 5  ;;  %v501_v55 = vshrl.u32 %v4723_v24, 16 }
  0x38   : > { %5762 = vst [vmem:[#allocation8_spill] sm:$0xff] %v4747_v43  ;;  %3740 = vmatprep.mubr.msk.bf16.mxu1 %vm775_vm3, %v4747_v43  ;;  %v481_v56 = vrot.slane %v480_v44, 4  ;;  %v507_v58 = vshll.u32 %v4740_v8, 16  ;;  %v512_v59 = vshrl.u32 %v4745_v42, 16  ;;  %v515_v60 = vshll.u32 %v4745_v42, 16 }
  0x39   : > { %3873 = vmatmul.mubr.msk.bf16.gmra.mrb[4].mxu0 %vm775_vm3, %v4747_v43  ;;  %v476_v61 = vsel %vm4622_vm4, %v471_v51, %v475_v29  ;;  %v494_v63 = vor.u32 %v493_v52, %v490_v49  ;;  %v503_v0 = vrot.slane %v501_v55, 4  ;;  %v521_v12 = vshll.u32 %v4750_v50, 16 }
  0x3a   : > { %v486_v17 = vsel %vm4622_vm4, %v481_v56, %v485_v47  ;;  %v509_v21 = vrot.slane %v507_v58, 5  ;;  %v514_v22 = vrot.slane %v512_v59, 4  ;;  %v517_v26 = vrot.slane %v515_v60, 5  ;;  %v4786_v47 = vld [vmem:[%s4586_s13 + $0x68] sm:$0x1] }
  0x3b   : > { %v4774_v6 = vcombine.low %v476_v61, %v486_v17  ;;  %v495_v29 = vrot.slane %v494_v63, 4  ;;  %v504_v30 = vor.u32 %v503_v0, %v499_v54  ;;  %v523_v31 = vrot.slane %v521_v12, 5  ;;  %v4791_v59 = vld [vmem:[%s4586_s13 + $0x6c] sm:$0xf]  ;;  %v4797_v0 = vld [vmem:[%s4586_s13 + $0x70] sm:$0xf] }
  0x3c   : > { %v518_v35 = vor.u32 %v517_v26, %v514_v22  ;;  %v525_v36 = vshrl.u32 %v4750_v50, 16  ;;  %v531_v37 = vshll.u32 %v4763_v11, 16  ;;  %v536_v40 = vshrl.u32 %v4767_v15, 16 }
  0x3d   : > { %5763 = vst [vmem:[#allocation9_spill] sm:$0xff] %v4774_v6  ;;  %3876 = vmatprep.mubr.msk.bf16.mxu0 %vm775_vm3, %v4774_v6  ;;  %3741 = vmatmul.mubr.msk.bf16.gmra.mrb[8].mxu1 %vm775_vm3, %v4774_v6  ;;  %v500_v41 = vsel %vm4622_vm4, %v495_v29, %v499_v54  ;;  %v505_v44 = vrot.slane %v504_v30, 4  ;;  %v539_v49 = vshll.u32 %v4767_v15, 16  ;;  %v545_v51 = vshll.u32 %v4772_v27, 16  ;;  %v4805_v29 = vld [vmem:[%s4586_s13 + $0x74] sm:$0x1] }
  0x3e   : > { %v519_v52 = vrot.slane %v518_v35, 4  ;;  %v527_v55 = vrot.slane %v525_v36, 4  ;;  %v533_v56 = vrot.slane %v531_v37, 5  ;;  %v538_v58 = vrot.slane %v536_v40, 4  ;;  %v4810_v37 = vld [vmem:[%s4586_s13 + $0x78] sm:$0xf] }
  0x3f   : > { %v510_v60 = vsel %vm4622_vm4, %v505_v44, %v509_v21  ;;  %v541_v61 = vrot.slane %v539_v49, 5  ;;  %v547_v54 = vrot.slane %v545_v51, 5  ;;  %v549_v63 = vshrl.u32 %v4772_v27, 16  ;;  %v4819_v49 = vld [vmem:[%s4586_s13 + $0x7c] sm:$0xf] }
  0x40   : > { %v4799_v12 = vcombine.low %v500_v41, %v510_v60  ;;  %v524_v17 = vsel %vm4622_vm4, %v519_v52, %v523_v31  ;;  %v528_v22 = vor.u32 %v527_v55, %v523_v31  ;;  %v555_v26 = vshll.u32 %v4786_v47, 16 }
  0x41   : > { %v542_v30 = vor.u32 %v541_v61, %v538_v58  ;;  %v551_v35 = vrot.slane %v549_v63, 4  ;;  %v560_v21 = vshrl.u32 %v4791_v59, 16  ;;  %v563_v36 = vshll.u32 %v4791_v59, 16 }
  0x42   : > { %5764 = vst [vmem:[#allocation10_spill] sm:$0xff] %v4799_v12  ;;  %3877 = vmatmul.mubr.msk.bf16.gmra.mrb[8].mxu0 %vm775_vm3, %v4799_v12  ;;  %3744 = vmatprep.mubr.msk.bf16.mxu1 %vm775_vm3, %v4799_v12  ;;  %v529_v31 = vrot.slane %v528_v22, 4  ;;  %v557_v40 = vrot.slane %v555_v26, 5  ;;  %v569_v41 = vshll.u32 %v4797_v0, 16  ;;  %v573_v44 = vshrl.u32 %v4797_v0, 16 }
  0x43   : > { %v543_v51 = vrot.slane %v542_v30, 4  ;;  %v552_v52 = vor.u32 %v551_v35, %v547_v54  ;;  %v562_v55 = vrot.slane %v560_v21, 4  ;;  %v565_v58 = vrot.slane %v563_v36, 5 }
  0x44   : > { %v534_v60 = vsel %vm4622_vm4, %v529_v31, %v533_v56  ;;  %v571_v61 = vrot.slane %v569_v41, 5  ;;  %v575_v63 = vrot.slane %v573_v44, 4  ;;  %v579_v3 = vshll.u32 %v4805_v29, 16  ;;  %v4842_v41 = vld [vmem:[%s4586_s13 + $0x84] sm:$0xf] }
  0x45   : > { %v4827_v22 = vcombine.low %v524_v17, %v534_v60  ;;  %v548_v26 = vsel %vm4622_vm4, %v543_v51, %v547_v54  ;;  %v553_v45 = vrot.slane %v552_v52, 4  ;;  %v566_v30 = vor.u32 %v565_v58, %v562_v55  ;;  %v4847_v58 = vld [vmem:[%s4586_s13 + $0x88] sm:$0xf] }
  0x46   : > { %v576_v35 = vor.u32 %v575_v63, %v571_v61  ;;  %v581_v21 = vrot.slane %v579_v3, 5  ;;  %v584_v36 = vshrl.u32 %v4810_v37, 16  ;;  %v587_v56 = vshll.u32 %v4810_v37, 16 }
  0x47   : > { %5765 = vst [vmem:[#allocation11_spill] sm:$0xff] %v4827_v22  ;;  %3880 = vmatprep.mubr.msk.bf16.mxu0 %vm775_vm3, %v4827_v22  ;;  %3745 = vmatmul.mubr.msk.bf16.gmra.mrb[12].mxu1 %vm775_vm3, %v4827_v22  ;;  %v558_v54 = vsel %vm4622_vm4, %v553_v45, %v557_v40  ;;  %v567_v17 = vrot.slane %v566_v30, 4  ;;  %v593_v31 = vshll.u32 %v4819_v49, 16  ;;  %v597_v3 = vshrl.u32 %v4819_v49, 16 }
  0x48   : > { %v4844_v44 = vcombine.low %v548_v26, %v558_v54  ;;  %v577_v51 = vrot.slane %v576_v35, 4  ;;  %v586_v52 = vrot.slane %v584_v36, 4  ;;  %v589_v55 = vrot.slane %v587_v56, 5  ;;  %v4859_v35 = vld [vmem:[%s4586_s13 + $0x8c] sm:$0x1] }
  0x49   : > { %v572_v60 = vsel %vm4622_vm4, %v567_v17, %v571_v61  ;;  %v595_v45 = vrot.slane %v593_v31, 5  ;;  %v599_v40 = vrot.slane %v597_v3, 4  ;;  %v603_v63 = vshll.u32 %v4825_v1, 16  ;;  %v4864_v56 = vld [vmem:[%s4586_s13 + $0x90] sm:$0xf] }
  0x4a   : > { %5766 = vst [vmem:[#allocation12_spill] sm:$0xff] %v4844_v44  ;;  %3881 = vmatmul.mubr.msk.bf16.gmra.mrb[12].mxu0 %vm775_vm3, %v4844_v44  ;;  %3748 = vmatprep.mubr.msk.bf16.mxu1 %vm775_vm3, %v4844_v44  ;;  %v582_v26 = vsel %vm4622_vm4, %v577_v51, %v581_v21  ;;  %v590_v30 = vor.u32 %v589_v55, %v586_v52  ;;  %v608_v36 = vshrl.u32 %v4842_v41, 16  ;;  %v611_v61 = vshll.u32 %v4842_v41, 16  ;;  %v4871_v51 = vld [vmem:[%s4586_s13 + $0x94] sm:$0xf] }
  0x4b   : > { %5767 = vst [vmem:[#allocation13_spill] sm:$0xff] %v4864_v56  ;;  %v4866_v54 = vcombine.low %v572_v60, %v582_v26  ;;  %v600_v17 = vor.u32 %v599_v40, %v595_v45  ;;  %v605_v31 = vrot.slane %v603_v63, 5  ;;  %v617_v3 = vshll.u32 %v4847_v58, 16 }
  0x4c   : > { %v591_v2 = vrot.slane %v590_v30, 4  ;;  %v610_v44 = vrot.slane %v608_v36, 4  ;;  %v613_v22 = vrot.slane %v611_v61, 5  ;;  %v621_v21 = vshrl.u32 %v4847_v58, 16  ;;  %v4880_v36 = vld [vmem:[%s4586_s13 + $0x98] sm:$0x1] }
  0x4d   : > { %5768 = vst [vmem:[#allocation14_spill] sm:$0xff] %v4866_v54  ;;  %3884 = vmatprep.mubr.msk.bf16.mxu0 %vm775_vm3, %v4866_v54  ;;  %v601_v52 = vrot.slane %v600_v17, 4  ;;  %v619_v55 = vrot.slane %v617_v3, 5  ;;  %v627_v60 = vshll.u32 %v4859_v35, 16  ;;  %v632_v40 = vshrl.u32 %v4864_v56, 16  ;;  %5769 = vst [vmem:[#allocation15_spill] sm:$0xff] %v4880_v36 }
  0x4e   : > { %v596_v63 = vsel %vm4622_vm4, %v591_v2, %v595_v45  ;;  %v614_v26 = vor.u32 %v613_v22, %v610_v44  ;;  %v623_v30 = vrot.slane %v621_v21, 4  ;;  %v635_v61 = vshll.u32 %v4864_v56, 16  ;;  %v4891_v44 = vld [vmem:[%s4586_s13 + $0x9c] sm:$0xf] }
  0x4f   : > { %3749 = vmatmul.mubr.msk.bf16.gmra.mrb[16].mxu1 %vm775_vm3, %v4866_v54  ;;  %v606_v17 = vsel %vm4622_vm4, %v601_v52, %v605_v31  ;;  %v629_v3 = vrot.slane %v627_v60, 5  ;;  %v634_v12 = vrot.slane %v632_v40, 4  ;;  %v641_v6 = vshll.u32 %v4871_v51, 16  ;;  %5771 = vst [vmem:[#allocation17_spill] sm:$0xff] %v4891_v44  ;;  %v4385_v31 = vld [vmem:[%s5726_s3 + $0x8] sm:$0xff]  }
  0x50   : > { %v4888_v43 = vcombine.low %v596_v63, %v606_v17  ;;  %v615_v25 = vrot.slane %v614_v26, 4  ;;  %v624_v2 = vor.u32 %v623_v30, %v619_v55  ;;  %v637_v22 = vrot.slane %v635_v61, 5  ;;  %v4910_v61 = vld [vmem:[%s4586_s13 + $0xa0] sm:$0xf] }
  0x51   : > { %v643_v45 = vrot.slane %v641_v6, 5  ;;  %v645_v21 = vshrl.u32 %v4871_v51, 16  ;;  %v651_v54 = vshll.u32 %v4880_v36, 16  ;;  %v3406_v52 = vrot.slane %v4600_v16, 9 }
  0x52   : > { %5770 = vst [vmem:[#allocation16_spill] sm:$0xff] %v4888_v43  ;;  %3885 = vmatmul.mubr.msk.bf16.gmra.mrb[16].mxu0 %vm775_vm3, %v4888_v43  ;;  %3752 = vmatprep.mubr.msk.bf16.mxu1 %vm775_vm3, %v4888_v43  ;;  %v620_v6 = vsel %vm4622_vm4, %v615_v25, %v619_v55  ;;  %v625_v60 = vrot.slane %v624_v2, 4  ;;  %v638_v40 = vor.u32 %v637_v22, %v634_v12  ;;  %v1309_v63 = vrot.slane %v4603_v18, 5  ;;  %v4919_v12 = vld [vmem:[%s4586_s13 + $0xa4] sm:$0x1] }
  0x53   : > { %v647_v26 = vrot.slane %v645_v21, 4  ;;  %v653_v30 = vrot.slane %v651_v54, 5  ;;  %v656_v16 = vshrl.u32 %v4891_v44, 16  ;;  %v659_v17 = vshll.u32 %v4891_v44, 16  ;;  %5774 = vst [vmem:[#allocation18_spill] sm:$0xff] %v4919_v12 }
  0x54   : > { %v630_v53 = vsel %vm4622_vm4, %v625_v60, %v629_v3  ;;  %v639_v43 = vrot.slane %v638_v40, 4  ;;  %v1310_v25 = vsel %vm4897_vm7, %v3406_v52, %v1309_v63  ;;  %v1311_v55 = vrot.slane %v1309_v63, 4  ;;  %v4932_v40 = vld [vmem:[%s4586_s13 + $0xa8] sm:$0xf] }
  0x55   : > { %v4921_v18 = vcombine.low %v620_v6, %v630_v53  ;;  %v648_v54 = vor.u32 %v647_v26, %v643_v45  ;;  %v658_v2 = vrot.slane %v656_v16, 4  ;;  %v661_v22 = vrot.slane %v659_v17, 5  ;;  %5777 = vst [vmem:[#allocation20_spill] sm:$0xff] %v4932_v40  ;;  %v4945_v17 = vld [vmem:[%s4586_s13 + $0xac] sm:$0xf] }
  0x56   : > { %v644_v21 = vsel %vm4622_vm4, %v639_v43, %v643_v45  ;;  %v5776_v36 = vrot.slane %v4606_v19, 5  ;;  %v665_v60 = vshll.u32 %v4910_v61, 16  ;;  %v669_v52 = vshrl.u32 %v4910_v61, 16  ;;  %5780 = vst [vmem:[#allocation22_spill] sm:$0xff] %v4945_v17 }
  0x57   : > { %5775 = vst [vmem:[#allocation19_spill] sm:$0xff] %v4921_v18  ;;  %3888 = vmatprep.mubr.msk.bf16.mxu0 %vm775_vm3, %v4921_v18  ;;  %3753 = vmatmul.mubr.msk.bf16.gmra.mrb[20].mxu1 %vm775_vm3, %v4921_v18  ;;  %v649_v53 = vrot.slane %v648_v54, 4  ;;  %v662_v19 = vor.u32 %v661_v22, %v658_v2  ;;  %v675_v45 = vshll.u32 %v4919_v12, 16  ;;  %v3407_v63 = vrot.slane %v4618_v33, 9  ;;  %v4950_v54 = vld [vmem:[%s4586_s13 + $0xb0] sm:$0x1] }
  0x58   : > { %v1313_v3 = vsel %vm4897_vm7, %v1311_v55, %v5776_v36  ;;  %v667_v36 = vrot.slane %v665_v60, 5  ;;  %v671_v6 = vrot.slane %v669_v52, 4  ;;  %v5779_v26 = vrot.slane %v4631_v39, 5  ;;  %5781 = vst [vmem:[#allocation23_spill] sm:$0xff] %v4950_v54 }
  0x59   : > { %v4938_v43 = vcombine.low %v1310_v25, %v1313_v3  ;;  %v654_v55 = vsel %vm4622_vm4, %v649_v53, %v653_v30  ;;  %v663_v44 = vrot.slane %v662_v19, 4  ;;  %v677_v18 = vrot.slane %v675_v45, 5 }
  0x5a   : > { %v1318_v16 = vrot.slane %v5779_v26, 4  ;;  %v680_v25 = vshrl.u32 %v4932_v40, 16  ;;  %v4953_v2 = vcombine.low %v644_v21, %v654_v55  ;;  %v672_v22 = vor.u32 %v671_v6, %v667_v36 }
  0x5b   : > { %5778 = vst [vmem:[#allocation21_spill] sm:$0xff] %v4938_v43  ;;  %v5783_v3 = vmov %v5779_v26  ;;  %v5784_v52 = vrot.slane %v4635_v46, 5  ;;  %v668_v53 = vsel %vm4622_vm4, %v663_v44, %v667_v36  ;;  %v683_v21 = vshll.u32 %v4932_v40, 16  ;;  %v4976_v36 = vld [vmem:[%s4586_s13 + $0xb4] sm:$0xf] }
  0x5c   : > { %5782 = vst [vmem:[#allocation24_spill] sm:$0xff] %v4953_v2  ;;  %v1317_v60 = vsel %vm4897_vm7, %v3407_v63, %v5783_v3  ;;  %v682_v45 = vrot.slane %v680_v25, 4  ;;  %3889 = vmatmul.mubr.msk.bf16.gmra.mrb[20].mxu0 %vm775_vm3, %v4953_v2  ;;  %3756 = vmatprep.mubr.msk.bf16.mxu1 %vm775_vm3, %v4953_v2  ;;  %v673_v46 = vrot.slane %v672_v22, 4  ;;  %v689_v6 = vshll.u32 %v4945_v17, 16  ;;  %v4984_v3 = vld [vmem:[%s4586_s13 + $0xb8] sm:$0xf] }
  0x5d   : > { %v1320_v30 = vsel %vm4897_vm7, %v1318_v16, %v5784_v52  ;;  %v693_v63 = vshrl.u32 %v4945_v17, 16  ;;  %v699_v44 = vshll.u32 %v4950_v54, 16  ;;  %3902 = vmatprep.mubr.msk.bf16.mxu0 %vm775_vm3, %v4938_v43  ;;  %v685_v26 = vrot.slane %v683_v21, 5  ;;  %v4989_v2 = vld [vmem:[%s4586_s13 + $0xbc] sm:$0x1] }
  0x5e   : > { %v4965_v19 = vcombine.low %v1317_v60, %v1320_v30  ;;  %v3408_v16 = vrot.slane %v4645_v57, 9  ;;  %v1323_v55 = vrot.slane %v4650_v62, 5  ;;  %v1326_v25 = vrot.slane %v4658_v4, 5 }
  0x5f   : > { %v678_v22 = vsel %vm4622_vm4, %v673_v46, %v677_v18  ;;  %v691_v60 = vrot.slane %v689_v6, 5  ;;  %v695_v52 = vrot.slane %v693_v63, 4  ;;  %v701_v30 = vrot.slane %v699_v44, 5 }
  0x60   : > { %v4991_v54 = vcombine.low %v668_v53, %v678_v22  ;;  %v686_v43 = vor.u32 %v685_v26, %v682_v45  ;;  %v1324_v21 = vsel %vm4897_vm7, %v3408_v16, %v1323_v55  ;;  %v1325_v12 = vrot.slane %v1323_v55, 4 }
  0x61   : > { %v696_v40 = vor.u32 %v695_v52, %v691_v60  ;;  %v704_v4 = vshrl.u32 %v4976_v36, 16  ;;  %v707_v17 = vshll.u32 %v4976_v36, 16  ;;  %v713_v56 = vshll.u32 %v4984_v3, 16 }
  0x62   : > { %3757 = vmatmul.mubr.msk.bf16.gmra.mrb[24].mxu1 %vm775_vm3, %v4991_v54  ;;  %v687_v18 = vrot.slane %v686_v43, 4  ;;  %v1327_v53 = vsel %vm4897_vm7, %v1325_v12, %v1326_v25  ;;  %v717_v45 = vshrl.u32 %v4984_v3, 16  ;;  %v723_v46 = vshll.u32 %v4989_v2, 16  ;;  %v5011_v43 = vld [vmem:[%s5724_s1 + $0xe] sm:$0x3] }
  0x63   : > { %v697_v6 = vrot.slane %v696_v40, 4  ;;  %v5004_v63 = vcombine.low %v1324_v21, %v1327_v53  ;;  %v706_v44 = vrot.slane %v704_v4, 4  ;;  %v709_v26 = vrot.slane %v707_v17, 5 }
  0x64   : > { %v692_v16 = vsel %vm4622_vm4, %v687_v18, %v691_v60  ;;  %v715_v55 = vrot.slane %v713_v56, 5  ;;  %v719_v22 = vrot.slane %v717_v45, 4  ;;  %v725_v52 = vrot.slane %v723_v46, 5  ;;  %3903 = vmatmul.mubr.msk.bf16.vlgmr.msra.gmra.mrb[0].mxu0 %vm775_vm3, %v4965_v19 }
  0x65   : > { %v702_v12 = vsel %vm4622_vm4, %v697_v6, %v701_v30  ;;  %v710_v40 = vor.u32 %v709_v26, %v706_v44  ;;  %v3409_v17 = vrot.slane %v4664_v14, 9  ;;  %v1330_v25 = vrot.slane %v4676_v28, 5  ;;  %3935 = vmatpush3.bf16.msra.mxu0 %v4610_v20  ;;  %3906 = vmatprep.mubr.msk.bf16.mxu0 %vm775_vm3, %v5004_v63 }
  0x66   : > { %v5020_v56 = vcombine.low %v692_v16, %v702_v12  ;;  %v720_v60 = vor.u32 %v719_v22, %v715_v55  ;;  %v1333_v21 = vrot.slane %v4683_v32, 5  ;;  %v3410_v4 = vrot.slane %v4691_v48, 9  ;;  %4322 = vmatprep.subr.msk.bf16.mxu0 %vm824_vm0, %v5011_v43 }
  0x67   : > { %v711_v18 = vrot.slane %v710_v40, 4  ;;  %v1331_v30 = vsel %vm4897_vm7, %v3409_v17, %v1330_v25  ;;  %v1332_v53 = vrot.slane %v1330_v25, 4  ;;  %v1337_v45 = vrot.slane %v4699_v7, 5 }
  0x68   : > { %3760 = vmatprep.mubr.msk.bf16.mxu1 %vm775_vm3, %v5020_v56  ;;  %v721_v20 = vrot.slane %v720_v60, 4  ;;  %v3373_v46 = vcombine.low %v4589_v9, %v4592_v10  ;;  %v1340_v32 = vrot.slane %v4711_v5, 5  ;;  %v1344_v6 = vrot.slane %v4723_v24, 5 }
  0x69   : > { %v716_v44 = vsel %vm4622_vm4, %v711_v18, %v715_v55  ;;  %v1334_v26 = vsel %vm4897_vm7, %v1332_v53, %v1333_v21  ;;  %v1338_v16 = vsel %vm4897_vm7, %v3410_v4, %v1337_v45  ;;  %v1339_v22 = vrot.slane %v1337_v45, 4 }
  0x6a   : > { %v726_v12 = vsel %vm4622_vm4, %v721_v20, %v725_v52  ;;  %v5045_v40 = vcombine.low %v1331_v30, %v1334_v26  ;;  %v3411_v9 = vrot.slane %v4716_v13, 9  ;;  %v1346_v10 = vrot.slane %v1344_v6, 4 }
  0x6b   : > { %v5048_v5 = vcombine.low %v716_v44, %v726_v12  ;;  %v1341_v55 = vsel %vm4897_vm7, %v1339_v22, %v1340_v32  ;;  %v1347_v17 = vrot.slane %v4740_v8, 5  ;;  %v3412_v60 = vrot.slane %v4745_v42, 9 }
  0x6c   : > { %v5053_v25 = vcombine.low %v1338_v16, %v1341_v55  ;;  %v1351_v21 = vrot.slane %v4750_v50, 5  ;;  %v1354_v52 = vrot.slane %v4763_v11, 5  ;;  %3907 = vmatmul.mubr.msk.bf16.gmra.mrb[4].mxu0 %vm775_vm3, %v5045_v40  ;;  %v1345_v8 = vsel %vm4897_vm7, %v3411_v9, %v1344_v6 }
  0x6d   : > { %3761 = vmatmul.mubr.msk.bf16.gmra.mrb[28].mxu1 %vm775_vm3, %v5048_v5  ;;  %v1348_v4 = vsel %vm4897_vm7, %v1346_v10, %v1347_v17  ;;  %v1358_v11 = vrot.slane %v4772_v27, 5  ;;  %v1365_v45 = vrot.slane %v4797_v0, 5  ;;  %v5077_v20 = vcombine.low %v4691_v48, %v4699_v7  ;;  %v5108_v7 = vld [vmem:[%s5724_s1 + $0x6] sm:$0x3] }
  0x6e   : > { %3766 = vmatprep.mubr.msk.bf16.mxu1 %vm775_vm3, %v3373_v46  ;;  %3910 = vmatprep.mubr.msk.bf16.mxu0 %vm775_vm3, %v5053_v25  ;;  %v1353_v18 = vrot.slane %v1351_v21, 4  ;;  %v1352_v30 = vsel %vm4897_vm7, %v3412_v60, %v1351_v21  ;;  %v5079_v46 = vcombine.low %v1345_v8, %v1348_v4  ;;  %v5083_v32 = vcombine.low %v4618_v33, %v4631_v39  ;;  %v5786_v4 = vld [vmem:[#allocation17_spill] sm:$0xff] }
  0x6f   : > { %v3413_v44 = vrot.slane %v4767_v15, 9  ;;  %v1360_v26 = vrot.slane %v1358_v11, 4  ;;  %v1361_v16 = vrot.slane %v4786_v47, 5  ;;  %v3414_v22 = vrot.slane %v4791_v59, 9 }
  0x70   : > { %v1355_v53 = vsel %vm4897_vm7, %v1353_v18, %v1354_v52  ;;  %v1367_v12 = vrot.slane %v1365_v45, 4  ;;  %v1368_v9 = vrot.slane %v4805_v29, 5  ;;  %v5093_v48 = vcombine.low %v4716_v13, %v4723_v24 }
  0x71   : > { %v5085_v6 = vcombine.low %v1352_v30, %v1355_v53  ;;  %v5097_v33 = vcombine.low %v4745_v42, %v4750_v50  ;;  %v1509_v39 = vsel %vm824_vm0, %v4671_v23, 0  ;;  %v1359_v23 = vsel %vm4897_vm7, %v3413_v44, %v1358_v11  ;;  %v5787_v11 = vld [vmem:[#allocation22_spill] sm:$0xff]  ;;  %v5788_v30 = vld [vmem:[#allocation20_spill] sm:$0xff] }
  0x72   : > { %v1362_v13 = vsel %vm4897_vm7, %v1360_v26, %v1361_v16  ;;  %v1372_v24 = vrot.slane %v4819_v49, 5  ;;  %v1366_v42 = vsel %vm4897_vm7, %v3414_v22, %v1365_v45  ;;  %v1369_v50 = vsel %vm4897_vm7, %v1367_v12, %v1368_v9  ;;  %v5789_v22 = vld [vmem:[#allocation15_spill] sm:$0xff] }
  0x73   : > { %v1379_v47 = vrot.slane %v4847_v58, 5  ;;  %v5126_v29 = vcombine.low %v4767_v15, %v4772_v27  ;;  %v5130_v10 = vcombine.low %v4791_v59, %v4797_v0  ;;  %v5136_v55 = vcombine.low %v4645_v57, %v4650_v62 }
  0x74   : > { %3911 = vmatmul.mubr.msk.bf16.gmra.mrb[8].mxu0 %vm775_vm3, %v5079_v46  ;;  %v5138_v17 = vcombine.low %v1359_v23, %v1362_v13  ;;  %v5142_v60 = vcombine.low %v4664_v14, %v4676_v28  ;;  %v3415_v15 = vrot.slane %v4810_v37, 9  ;;  %v5145_v27 = vcombine.low %v1366_v42, %v1369_v50 }
  0x75   : > { %3767 = vmatmul.mubr.msk.bf16.vlgmr.msra.gmra.mrb[0].mxu1 %vm775_vm3, %v4628_v38  ;;  %3914 = vmatprep.mubr.msk.bf16.mxu0 %vm775_vm3, %v5085_v6  ;;  %v1374_v21 = vrot.slane %v1372_v24, 4  ;;  %v1375_v59 = vrot.slane %v4825_v1, 5  ;;  %v3416_v0 = vrot.slane %v4842_v41, 9  ;;  %v1381_v52 = vrot.slane %v1379_v47, 4 }
  0x76   : > { %3770 = vmatprep.mubr.msk.bf16.mxu1 %vm775_vm3, %v5083_v32  ;;  %3799 = vmatpush3.bf16.msra.mxu1 %v1509_v39  ;;  %v1382_v8 = vrot.slane %v4859_v35, 5  ;;  %v5152_v57 = vcombine.low %v4810_v37, %v4819_v49  ;;  %v5156_v62 = vcombine.low %v4842_v41, %v4847_v58  ;;  %v1373_v1 = vsel %vm4897_vm7, %v3415_v15, %v1372_v24  ;;  %v5785_v58 = vld [vmem:[#allocation13_spill] sm:$0xff]  ;;  %v5790_v39 = vld [vmem:[#allocation18_spill] sm:$0xff] }
  0x77   : > { %4317 = vmatprep.subr.msk.bf16.mxu1 %vm824_vm0, %v5108_v7  ;;  %v1376_v14 = vsel %vm4897_vm7, %v1374_v21, %v1375_v59  ;;  %v1380_v28 = vsel %vm4897_vm7, %v3416_v0, %v1379_v47  ;;  %v1386_v37 = vrot.slane %v4871_v51, 5  ;;  %v1393_v41 = vrot.slane %v4910_v61, 5 }
  0x78   : > { %v1383_v49 = vsel %vm4897_vm7, %v1381_v52, %v1382_v8  ;;  %v5178_v35 = vcombine.low %v5785_v58, %v4871_v51  ;;  %v5182_v18 = vcombine.low %v5786_v4, %v4910_v61  ;;  %v5186_v53 = vcombine.low %v5788_v30, %v5787_v11  ;;  %v5791_v52 = vld [vmem:[#allocation23_spill] sm:$0xff] }
  0x79   : > { %v5190_v45 = vcombine.low %v4976_v36, %v4984_v3  ;;  %v5192_v44 = vcombine.low %v1373_v1, %v1376_v14  ;;  %v5194_v26 = vcombine.low %v1380_v28, %v1383_v49  ;;  %v3417_v16 = vrot.slane %v5785_v58, 9  ;;  %v5227_v49 = vld [vmem:[%s4586_s13 + $0xc4] sm:$0xf] }
  0x7a   : > { %v1388_v51 = vrot.slane %v1386_v37, 4  ;;  %v1389_v12 = vrot.slane %v5789_v22, 5  ;;  %v3418_v61 = vrot.slane %v5786_v4, 9  ;;  %v1395_v9 = vrot.slane %v1393_v41, 4  ;;  %v5247_v4 = vld [vmem:[%s4586_s13 + $0xc0] sm:$0xf] }
  0x7b   : > { %v1396_v23 = vrot.slane %v5790_v39, 5  ;;  %v1400_v13 = vrot.slane %v5787_v11, 5  ;;  %v1387_v24 = vsel %vm4897_vm7, %v3417_v16, %v1386_v37  ;;  %v1407_v15 = vrot.slane %v4984_v3, 5  ;;  %v327_v11 = vld [vmem:[%s4586_s13 + $0xc8] sm:$0x1] }
  0x7c   : > { %3915 = vmatmul.mubr.msk.bf16.gmra.mrb[12].mxu0 %vm775_vm3, %v5138_v17  ;;  %v1390_v42 = vsel %vm4897_vm7, %v1388_v51, %v1389_v12  ;;  %v1394_v50 = vsel %vm4897_vm7, %v3418_v61, %v1393_v41  ;;  %v3419_v59 = vrot.slane %v5788_v30, 9  ;;  %v1403_v8 = vrot.slane %v5791_v52, 5 }
  0x7d   : > { %3771 = vmatmul.mubr.msk.bf16.gmra.mrb[4].mxu1 %vm775_vm3, %v5136_v55  ;;  %3918 = vmatprep.mubr.msk.bf16.mxu0 %vm775_vm3, %v5145_v27  ;;  %v1397_v47 = vsel %vm4897_vm7, %v1395_v9, %v1396_v23  ;;  %v5218_v21 = vcombine.low %v1387_v24, %v1390_v42  ;;  %v1402_v0 = vrot.slane %v1400_v13, 4  ;;  %v3420_v14 = vrot.slane %v4976_v36, 9 }
  0x7e   : > { %3774 = vmatprep.mubr.msk.bf16.mxu1 %vm775_vm3, %v5142_v60  ;;  %v5222_v1 = vcombine.low %v1394_v50, %v1397_v47  ;;  %v1409_v28 = vrot.slane %v1407_v15, 4  ;;  %v1410_v37 = vrot.slane %v4989_v2, 5  ;;  %v1401_v3 = vsel %vm4897_vm7, %v3419_v59, %v1400_v13 }
  0x7f   : > { %v1404_v41 = vsel %vm4897_vm7, %v1402_v0, %v1403_v8  ;;  %v2137_v2 = vrot.slane %v5227_v49, 5  ;;  %v1408_v36 = vsel %vm4897_vm7, %v3420_v14, %v1407_v15  ;;  %v1909_v16 = vshrl.u32 %v5247_v4, 16 }
  0x80   : > { %v1411_v58 = vsel %vm4897_vm7, %v1409_v28, %v1410_v37  ;;  %v5250_v30 = vcombine.low %v1401_v3, %v1404_v41  ;;  %v1912_v51 = vshll.u32 %v5247_v4, 16  ;;  %v1918_v22 = vshll.u32 %v5227_v49, 16 }
  0x81   : > { %v1922_v12 = vshrl.u32 %v5227_v49, 16  ;;  %v5256_v61 = vcombine.low %v1408_v36, %v1411_v58  ;;  %v3487_v9 = vrot.slane %v5247_v4, 9  ;;  %v2139_v39 = vrot.slane %v2137_v2, 4 }
  0x82   : > { %v2140_v23 = vrot.slane %v327_v11, 5  ;;  %v1911_v13 = vrot.slane %v1909_v16, 4  ;;  %v1914_v24 = vrot.slane %v1912_v51, 5  ;;  %v1920_v42 = vrot.slane %v1918_v22, 5  ;;  %v4392_v22 = vld [vmem:[%s4586_s13] sm:$0xf] }
  0x83   : > { %v1924_v50 = vrot.slane %v1922_v12, 4  ;;  %v1928_v59 = vshll.u32 %v327_v11, 16  ;;  %v2138_v0 = vsel %vm4897_vm7, %v3487_v9, %v2137_v2  ;;  %v4390_v2 = vld [vmem:[%s4586_s13 + $0x4] sm:$0xf]  ;;  %v4391_v11 = vld [vmem:[%s4586_s13 + $0x8] sm:$0x1] }
  0x84   : > { %3919 = vmatmul.mubr.msk.bf16.gmra.mrb[16].mxu0 %vm775_vm3, %v5192_v44  ;;  %v1915_v47 = vor.u32 %v1914_v24, %v1911_v13  ;;  %v2141_v52 = vsel %vm4897_vm7, %v2139_v39, %v2140_v23  ;;  %v1302_v58 = vrot.slane %v4390_v2, 5  ;;  %v1305_v16 = vrot.slane %v4391_v11, 5  ;;  %v339_v39 = vld [vmem:[%s5724_s1 + $0x10] sm:$0x3]  ;;  %v5804_v11 = vld [vmem:[#allocation24_spill] sm:$0xff] }
  0x85   : > { %3775 = vmatmul.mubr.msk.bf16.gmra.mrb[8].mxu1 %vm775_vm3, %v5077_v20  ;;  %3922 = vmatprep.mubr.msk.bf16.mxu0 %vm775_vm3, %v5194_v26  ;;  %v1925_v15 = vor.u32 %v1924_v50, %v1920_v42  ;;  %v1930_v28 = vrot.slane %v1928_v59, 5  ;;  %v5271_v37 = vcombine.low %v2138_v0, %v2141_v52  ;;  %v2579_v51 = vsel %vm824_vm0, %v5011_v43, 0  ;;  %v4393_v50 = vld [vmem:[%s5724_s1 + $0x8] sm:$0x3]  ;;  %v5794_v0 = vld [vmem:[#allocation7_spill] sm:$0xff]  ;;  %v5795_v52 = vld [vmem:[#allocation8_spill] sm:$0xff] }
  0x86   : > { %3778 = vmatprep.mubr.msk.bf16.mxu1 %vm775_vm3, %v5093_v48  ;;  %v1916_v8 = vrot.slane %v1915_v47, 4  ;;  %v3405_v12 = vrot.slane %v4392_v22, 9  ;;  %v1304_v9 = vrot.slane %v1302_v58, 4  ;;  %v1713_v24 = vsel %vm824_vm0, %v5108_v7, 0  ;;  %v5366_v47 = vld [vmem:[%s4586_s13 + $0xcc] sm:$0xf] }
  0x87   : > { %v1926_v14 = vrot.slane %v1925_v15, 4  ;;  %v5355_v7 = vcombine.low %v5247_v4, %v5227_v49  ;;  %v5369_v15 = vld [vmem:[%s4586_s13 + $0xd0] sm:$0xf]  ;;  %v2789_v59 = vsel %vm824_vm0, %v339_v39, 0  ;;  %v2549_v2 = vshrl.u32 %v5366_v47, 16 }
  0x88   : > { %v1921_v3 = vsel %vm4622_vm4, %v1916_v8, %v1920_v42  ;;  %v1303_v43 = vsel %vm4897_vm7, %v3405_v12, %v1302_v58  ;;  %v1306_v23 = vsel %vm4897_vm7, %v1304_v9, %v1305_v16  ;;  %v5792_v42 = vld [vmem:[#allocation21_spill] sm:$0xff]  ;;  %v3505_v49 = vcombine.low %v5366_v47, %v5369_v15  ;;  %v5793_v4 = vld [vmem:[#allocation6_spill] sm:$0xff]  ;;  %v330_v12 = vld [vmem:[%s4586_s13 + $0xd4] sm:$0x1] }
  0x89   : > { %v1931_v41 = vsel %vm4622_vm4, %v1926_v14, %v1930_v28  ;;  %v3421_v13 = vcombine.low %v1303_v43, %v1306_v23  ;;  %v5796_v8 = vld [vmem:[#allocation9_spill] sm:$0xff]  ;;  %v5797_v14 = vld [vmem:[#allocation10_spill] sm:$0xff]  ;;  %v5798_v28 = vld [vmem:[#allocation11_spill] sm:$0xff]  ;;  %v2562_v58 = vshrl.u32 %v5369_v15, 16  ;;  %v2551_v16 = vrot.slane %v2549_v2, 4 }
  0x8a   : > { %v5277_v36 = vcombine.low %v1921_v3, %v1931_v41  ;;  %v5799_v3 = vld [vmem:[#allocation12_spill] sm:$0xff]  ;;  %v5800_v41 = vld [vmem:[#allocation5_spill] sm:$0xff]  ;;  %v2777_v34 = vrot.slane %v5369_v15, 5 }
  0x8b   : > { %v2564_v22 = vrot.slane %v2562_v58, 4 }
  0x8c   : > { %3923 = vmatmul.mubr.msk.bf16.gmra.mrb[20].mxu0 %vm775_vm3, %v5218_v21 }
  0x8d   : > { %3779 = vmatmul.mubr.msk.bf16.gmra.mrb[12].mxu1 %vm775_vm3, %v5097_v33  ;;  %3926 = vmatprep.mubr.msk.bf16.mxu0 %vm775_vm3, %v5222_v1 }
  0x8e   : > { %3782 = vmatprep.mubr.msk.bf16.mxu1 %vm775_vm3, %v5126_v29 }
  0x94   : > { %3927 = vmatmul.mubr.msk.bf16.gmra.mrb[24].mxu0 %vm775_vm3, %v5250_v30 }
  0x95   : > { %3783 = vmatmul.mubr.msk.bf16.gmra.mrb[16].mxu1 %vm775_vm3, %v5130_v10  ;;  %3930 = vmatprep.mubr.msk.bf16.mxu0 %vm775_vm3, %v5256_v61 }
  0x96   : > { %3786 = vmatprep.mubr.msk.bf16.mxu1 %vm775_vm3, %v5152_v57 }
  0x9c   : > { %3931 = vmatmul.mubr.msk.bf16.gmra.mrb[28].mxu0 %vm775_vm3, %v5271_v37 }
  0x9d   : > { %3787 = vmatmul.mubr.msk.bf16.gmra.mrb[20].mxu1 %vm775_vm3, %v5156_v62  ;;  %3936 = vmatprep.mubr.msk.bf16.mxu0 %vm775_vm3, %v5083_v32 }
  0x9e   : > { %3790 = vmatprep.mubr.msk.bf16.mxu1 %vm775_vm3, %v5178_v35 }
  0xa4   : > { %3937 = vmatmul.mubr.msk.bf16.vlgmr.msra.gmra.mrb[0].mxu0 %vm775_vm3, %v5136_v55 }
  0xa5   : > { %3791 = vmatmul.mubr.msk.bf16.gmra.mrb[24].mxu1 %vm775_vm3, %v5182_v18  ;;  %3969 = vmatpush3.bf16.msra.mxu0 %v2579_v51 }
  0xa6   : > { %3794 = vmatprep.mubr.msk.bf16.mxu1 %vm775_vm3, %v5186_v53  ;;  %3940 = vmatprep.mubr.msk.bf16.mxu0 %vm775_vm3, %v5142_v60 }
  0xa7   : > { %4323 = vmatprep.subr.msk.bf16.mxu0 %vm824_vm0, %v339_v39  ;;  %v2568_v39 = vshll.u32 %v330_v12, 16 }
  0xac   : > { %3941 = vmatmul.mubr.msk.bf16.gmra.mrb[4].mxu0 %vm775_vm3, %v5077_v20 }
  0xad   : > { %3795 = vmatmul.mubr.msk.bf16.gmra.mrb[28].mxu1 %vm775_vm3, %v5190_v45  ;;  %3944 = vmatprep.mubr.msk.bf16.mxu0 %vm775_vm3, %v5093_v48 }
  0xae   : > { %3800 = vmatprep.mubr.msk.bf16.mxu1 %vm775_vm3, %v3421_v13  ;;  %v2570_v13 = vrot.slane %v2568_v39, 5 }
  0xb4   : > { %3945 = vmatmul.mubr.msk.bf16.gmra.mrb[8].mxu0 %vm775_vm3, %v5097_v33 }
  0xb5   : > { %3801 = vmatmul.mubr.msk.bf16.vlgmr.msra.gmra.mrb[0].mxu1 %vm775_vm3, %v5792_v42  ;;  %3948 = vmatprep.mubr.msk.bf16.mxu0 %vm775_vm3, %v5126_v29 }
  0xb6   : > { %3804 = vmatprep.mubr.msk.bf16.mxu1 %vm775_vm3, %v4965_v19  ;;  %3833 = vmatpush3.bf16.msra.mxu1 %v1713_v24 }
  0xb7   : > { %4319 = vmatprep.subr.msk.bf16.mxu1 %vm824_vm0, %v4393_v50 }
  0xbc   : > { %3949 = vmatmul.mubr.msk.bf16.gmra.mrb[12].mxu0 %vm775_vm3, %v5130_v10 }
  0xbd   : > { %3805 = vmatmul.mubr.msk.bf16.gmra.mrb[4].mxu1 %vm775_vm3, %v5004_v63  ;;  %3952 = vmatprep.mubr.msk.bf16.mxu0 %vm775_vm3, %v5152_v57 }
  0xbe   : > { %3808 = vmatprep.mubr.msk.bf16.mxu1 %vm775_vm3, %v5045_v40 }
  0xc4   : > { %3953 = vmatmul.mubr.msk.bf16.gmra.mrb[16].mxu0 %vm775_vm3, %v5156_v62 }
  0xc5   : > { %3809 = vmatmul.mubr.msk.bf16.gmra.mrb[8].mxu1 %vm775_vm3, %v5053_v25  ;;  %3956 = vmatprep.mubr.msk.bf16.mxu0 %vm775_vm3, %v5178_v35 }
  0xc6   : > { %3812 = vmatprep.mubr.msk.bf16.mxu1 %vm775_vm3, %v5079_v46 }
  0xcc   : > { %3957 = vmatmul.mubr.msk.bf16.gmra.mrb[20].mxu0 %vm775_vm3, %v5182_v18 }
  0xcd   : > { %3813 = vmatmul.mubr.msk.bf16.gmra.mrb[12].mxu1 %vm775_vm3, %v5085_v6  ;;  %3960 = vmatprep.mubr.msk.bf16.mxu0 %vm775_vm3, %v5186_v53 }
  0xce   : > { %3816 = vmatprep.mubr.msk.bf16.mxu1 %vm775_vm3, %v5138_v17 }
  0xd4   : > { %3961 = vmatmul.mubr.msk.bf16.gmra.mrb[24].mxu0 %vm775_vm3, %v5190_v45 }
  0xd5   : > { %3817 = vmatmul.mubr.msk.bf16.gmra.mrb[16].mxu1 %vm775_vm3, %v5145_v27  ;;  %3964 = vmatprep.mubr.msk.bf16.mxu0 %vm775_vm3, %v5355_v7 }
  0xd6   : > { %3820 = vmatprep.mubr.msk.bf16.mxu1 %vm775_vm3, %v5192_v44 }
  0xdc   : > { %3965 = vmatmul.mubr.msk.bf16.gmra.mrb[28].mxu0 %vm775_vm3, %v3505_v49 }
  0xdd   : > { %3821 = vmatmul.mubr.msk.bf16.gmra.mrb[20].mxu1 %vm775_vm3, %v5194_v26  ;;  %3970 = vmatprep.mubr.msk.bf16.mxu0 %vm775_vm3, %v5793_v4 }
  0xde   : > { %3824 = vmatprep.mubr.msk.bf16.mxu1 %vm775_vm3, %v5218_v21 }
  0xe4   : > { %3971 = vmatmul.mubr.msk.bf16.vlgmr.msra.gmra.mrb[0].mxu0 %vm775_vm3, %v5794_v0 }
  0xe5   : > { %3825 = vmatmul.mubr.msk.bf16.gmra.mrb[24].mxu1 %vm775_vm3, %v5222_v1  ;;  %4003 = vmatpush3.bf16.msra.mxu0 %v2789_v59 }
  0xe6   : > { %3828 = vmatprep.mubr.msk.bf16.mxu1 %vm775_vm3, %v5250_v30  ;;  %3974 = vmatprep.mubr.msk.bf16.mxu0 %vm775_vm3, %v5795_v52  ;;  %v5547_v52 = vld [vmem:[%s5725_s2] ss:$0 sm:$0xff] }
  0xec   : > { %3975 = vmatmul.mubr.msk.bf16.gmra.mrb[4].mxu0 %vm775_vm3, %v5796_v8 }
  0xed   : > { %3829 = vmatmul.mubr.msk.bf16.gmra.mrb[28].mxu1 %vm775_vm3, %v5256_v61  ;;  %3978 = vmatprep.mubr.msk.bf16.mxu0 %vm775_vm3, %v5797_v14 }
  0xee   : > { %3834 = vmatprep.mubr.msk.bf16.mxu1 %vm775_vm3, %v4628_v38  ;;  %v5801_v38 = vld [vmem:[#allocation14_spill] sm:$0xff] }
  0xf4   : > { %3979 = vmatmul.mubr.msk.bf16.gmra.mrb[8].mxu0 %vm775_vm3, %v5798_v28 }
  0xf5   : > { %3835 = vmatmul.mubr.msk.bf16.vlgmr.msra.gmra.mrb[0].mxu1 %vm775_vm3, %v5083_v32  ;;  %3982 = vmatprep.mubr.msk.bf16.mxu0 %vm775_vm3, %v5799_v3  ;;  %v5802_v32 = vld [vmem:[#allocation16_spill] sm:$0xff] }
  0xf6   : > { %3838 = vmatprep.mubr.msk.bf16.mxu1 %vm775_vm3, %v5136_v55  ;;  %4057 = vmatpush3.bf16.msra.mxu1 %v5800_v41  ;;  %v5803_v55 = vld [vmem:[#allocation19_spill] sm:$0xff] }
  0xfc   : > { %3983 = vmatmul.mubr.msk.bf16.gmra.mrb[12].mxu0 %vm775_vm3, %v5801_v38 }
  0xfd   : > { %3839 = vmatmul.mubr.msk.bf16.gmra.mrb[4].mxu1 %vm775_vm3, %v5142_v60  ;;  %3986 = vmatprep.mubr.msk.bf16.mxu0 %vm775_vm3, %v5802_v32  ;;  %v2552_v60 = vshll.u32 %v5366_v47, 16 }
  0xfe   : > { %3842 = vmatprep.mubr.msk.bf16.mxu1 %vm775_vm3, %v5077_v20  ;;  %v2558_v20 = vshll.u32 %v5369_v15, 16 }
  0xff   : > { %v2554_v51 = vrot.slane %v2552_v60, 5 }
 0x104   : > { %3987 = vmatmul.mubr.msk.bf16.gmra.mrb[16].mxu0 %vm775_vm3, %v5803_v55 }
 0x105   : > { %3843 = vmatmul.mubr.msk.bf16.gmra.mrb[8].mxu1 %vm775_vm3, %v5093_v48  ;;  %3990 = vmatprep.mubr.msk.bf16.mxu0 %vm775_vm3, %v5804_v11  ;;  %v2560_v48 = vrot.slane %v2558_v20, 5 }
 0x106   : > { %3846 = vmatprep.mubr.msk.bf16.mxu1 %vm775_vm3, %v5097_v33  ;;  %v2555_v33 = vor.u32 %v2554_v51, %v2551_v16 }
 0x107   : > { %v2565_v9 = vor.u32 %v2564_v22, %v2560_v48 }
 0x108   : > { %v2556_v43 = vrot.slane %v2555_v33, 4 }
 0x109   : > { %v2566_v23 = vrot.slane %v2565_v9, 4 }
 0x10c   : > { %3991 = vmatmul.mubr.msk.bf16.gmra.mrb[20].mxu0 %vm775_vm3, %v4991_v54 }
 0x10d   : > { %3847 = vmatmul.mubr.msk.bf16.gmra.mrb[12].mxu1 %vm775_vm3, %v5126_v29  ;;  %3994 = vmatprep.mubr.msk.bf16.mxu0 %vm775_vm3, %v5020_v56  ;;  %v2561_v29 = vsel %vm4622_vm4, %v2556_v43, %v2560_v48 }
 0x10e   : > { %3850 = vmatprep.mubr.msk.bf16.mxu1 %vm775_vm3, %v5130_v10  ;;  %v2571_v10 = vsel %vm4622_vm4, %v2566_v23, %v2570_v13 }
 0x10f   : > { %v3522_v24 = vcombine.low %v2561_v29, %v2571_v10 }
 0x114   : > { %3995 = vmatmul.mubr.msk.bf16.gmra.mrb[24].mxu0 %vm775_vm3, %v5048_v5 }
 0x115   : > { %3851 = vmatmul.mubr.msk.bf16.gmra.mrb[16].mxu1 %vm775_vm3, %v5152_v57  ;;  %3998 = vmatprep.mubr.msk.bf16.mxu0 %vm775_vm3, %v5277_v36 }
 0x116   : > { %3854 = vmatprep.mubr.msk.bf16.mxu1 %vm775_vm3, %v5156_v62 }
 0x11c   : > { %3999 = vmatmul.mubr.msk.bf16.gmra.mrb[28].mxu0 %vm775_vm3, %v3522_v24 }
 0x11d   : > { %3855 = vmatmul.mubr.msk.bf16.gmra.mrb[20].mxu1 %vm775_vm3, %v5178_v35  ;;  %4004 = vmatprep.mubr.msk.bf16.mxu0 %vm775_vm3, %v4965_v19  ;;  %v2779_v19 = vrot.slane %v2777_v34, 4 }
 0x11e   : > { %3858 = vmatprep.mubr.msk.bf16.mxu1 %vm775_vm3, %v5182_v18 }
 0x124   : > { %4005 = vmatmul.mubr.msk.bf16.vlgmr.msra.gmra.mrb[0].mxu0 %vm775_vm3, %v5004_v63  ;;  %v2780_v63 = vrot.slane %v330_v12, 5 }
 0x125   : > { %3859 = vmatmul.mubr.msk.bf16.gmra.mrb[24].mxu1 %vm775_vm3, %v5186_v53  ;;  %4008 = vmatprep.mubr.msk.bf16.mxu0 %vm775_vm3, %v5045_v40 }
 0x126   : > { %3862 = vmatprep.mubr.msk.bf16.mxu1 %vm775_vm3, %v5190_v45  ;;  %v2781_v40 = vsel %vm4897_vm7, %v2779_v19, %v2780_v63 }
 0x12c   : > { %4009 = vmatmul.mubr.msk.bf16.gmra.mrb[4].mxu0 %vm775_vm3, %v5053_v25 }
 0x12d   : > { %3863 = vmatmul.mubr.msk.bf16.gmra.mrb[28].mxu1 %vm775_vm3, %v5355_v7  ;;  %4012 = vmatprep.mubr.msk.bf16.mxu0 %vm775_vm3, %v5079_v46  ;;  %v4384_v46 = vld [vmem:[%s5726_s3] sm:$0xff]  }
 0x12e   : > { %3892 = vmatprep.mubr.msk.bf16.mxu1 %vm775_vm3, %v4991_v54  ;;  %v3539_v54 = vrot.slane %v5366_v47, 9 }
 0x134   : > { %4013 = vmatmul.mubr.msk.bf16.gmra.mrb[8].mxu0 %vm775_vm3, %v5085_v6 }
 0x135   : > { %3893 = vmatmul.mubr.msk.bf16.vlgmr.msra.gmra.mrb[24].mxu1 %vm775_vm3, %v5020_v56  ;;  %4016 = vmatprep.mubr.msk.bf16.mxu0 %vm775_vm3, %v5138_v17  ;;  %v2778_v56 = vsel %vm4897_vm7, %v3539_v54, %v2777_v34  ;;  %v4458_v17 = vmov 0.0  }
 0x136   : > { %3896 = vmatprep.mubr.msk.bf16.mxu1 %vm775_vm3, %v5048_v5  ;;  %v3540_v5 = vcombine.low %v2778_v56, %v2781_v40  ;;  %4036 = vmatprep.subr.bf16.mxu1 %v4458_v17 }
 0x137   : > { %4037 = vmatpush3.bf16.msra.mxu1 %v4384_v46 }
 0x138   : > { %4038 = vmatprep.subr.bf16.mxu1 %v4458_v17 }
 0x13b   : > { %4039 = vmatpush3.bf16.msra.mxu1 %v4385_v31 }
 0x13c   : > { %4017 = vmatmul.mubr.msk.bf16.gmra.mrb[12].mxu0 %vm775_vm3, %v5145_v27  ;;  %4044 = vmatprep.subr.bf16.mxu1 %v4458_v17 }
 0x13d   : > { %3897 = vmatmul.mubr.msk.bf16.gmra.mrb[28].mxu1 %vm775_vm3, %v5277_v36  ;;  %4020 = vmatprep.mubr.msk.bf16.mxu0 %vm775_vm3, %v5192_v44 }
 0x13e   : > { %4040 = vmatprep.mubr.msk.bf16.mxu1 %vm4459_vm8, %v4458_v17 }
 0x144   : > { %4021 = vmatmul.mubr.msk.bf16.gmra.mrb[16].mxu0 %vm775_vm3, %v5194_v26 }
 0x145   : > { %4024 = vmatprep.mubr.msk.bf16.mxu0 %vm775_vm3, %v5218_v21 }
 0x14c   : > { %4025 = vmatmul.mubr.msk.bf16.gmra.mrb[20].mxu0 %vm775_vm3, %v5222_v1 }
 0x14d   : > { %4028 = vmatprep.mubr.msk.bf16.mxu0 %vm775_vm3, %v5250_v30 }
 0x154   : > { %4029 = vmatmul.mubr.msk.bf16.gmra.mrb[24].mxu0 %vm775_vm3, %v5256_v61 }
 0x155   : > { %4032 = vmatprep.mubr.msk.bf16.mxu0 %vm775_vm3, %v5271_v37 }
 0x15c   : > { %4033 = vmatmul.mubr.msk.bf16.gmra.mrb[28].mxu0 %vm775_vm3, %v3540_v5 }
 0x1c8   : > { %v3836_v25 = vpop.f32.mrb[0].mxu1 }
 0x1c9   : > { %v1749_v6 = vpop.f32.mrb[1].mxu1 }
 0x1ca   : > { %v3837_v27 = vpop.f32.mrb[2].mxu1 }
 0x1cb   : > { %v1752_v57 = vpop.f32.mrb[3].mxu1 }
 0x1d0   : > { %v3840_v62 = vpop.f32.mrb[4].mxu1 }
 0x1d1   : > { %v1765_v35 = vpop.f32.mrb[5].mxu1 }
 0x1d2   : > { %v3841_v18 = vpop.f32.mrb[6].mxu1 }
 0x1d3   : > { %v1768_v53 = vpop.f32.mrb[7].mxu1 }
 0x1d8   : > { %v3844_v45 = vpop.f32.mrb[8].mxu1 }
 0x1d9   : > { %v5514_v44 = vpop.f32.mrb[9].mxu1 }
 0x1da   : > { %v5516_v26 = vpop.f32.mrb[10].mxu1 }
 0x1db   : > { %v5518_v21 = vpop.f32.mrb[11].mxu1 }
 0x1e0   : > { %v5520_v1 = vpop.f32.mrb[12].mxu1 }
 0x1e1   : > { %v5522_v30 = vpop.f32.mrb[13].mxu1 }
 0x1e2   : > { %v5524_v61 = vpop.f32.mrb[14].mxu1 }
 0x1e3   : > { %v5526_v37 = vpop.f32.mrb[15].mxu1 }
 0x1e8   : > { %v5528_v36 = vpop.f32.mrb[16].mxu1 }
 0x1e9   : > { %v5530_v42 = vpop.f32.mrb[17].mxu1 }
 0x1ea   : > { %v5532_v50 = vpop.f32.mrb[18].mxu1 }
 0x1eb   : > { %v5534_v7 = vpop.f32.mrb[19].mxu1 }
 0x1f0   : > { %v5536_v47 = vpop.f32.mrb[20].mxu1 }
 0x1f1   : > { %v5538_v15 = vpop.f32.mrb[21].mxu1 }
 0x1f2   : > { %v5540_v49 = vpop.f32.mrb[22].mxu1 }
 0x1f3   : > { %v5542_v4 = vpop.f32.mrb[23].mxu1 }
 0x1f7   : > { %v4006_v59 = vpop.f32.mrb[0].mxu0 }
 0x1f8   : > { %v4058_v0 = vadd.f32 %v4006_v59, %v3836_v25  ;;  %v2825_v8 = vpop.f32.mrb[1].mxu0 }
 0x1f9   : > { %v4059_v14 = vadd.f32 %v2825_v8, %v1749_v6  ;;  %v4007_v28 = vpop.f32.mrb[2].mxu0 }
 0x1fa   : > { %v4060_v3 = vadd.f32 %v4007_v28, %v3837_v27  ;;  %v2828_v41 = vpop.f32.mrb[3].mxu0  ;;  %v2993_v38 = vadd.f32 %v4058_v0, %v5547_v52 }
 0x1fb   : > { %v2991_v32 = vadd.f32 %v4059_v14, %v5547_v52  ;;  %v4061_v55 = vadd.f32 %v2828_v41, %v1752_v57 }
 0x1fc   : > { %v2994_v60 = vadd.f32 %v4060_v3, %v5547_v52  ;;  %v3025_v11 = vmax.f32 %v2993_v38, 0.0 }
 0x1fd   : > { %v3023_v2 = vmax.f32 %v2991_v32, 0.0  ;;  %v2992_v58 = vadd.f32 %v4061_v55, %v5547_v52 }
 0x1fe   : > { %v3026_v12 = vmax.f32 %v2994_v60, 0.0  ;;  %v3059_v29 = vsel %vm3055_vm9, %v3025_v11, 0.0 }
 0x1ff   : > { %v3024_v20 = vmax.f32 %v2992_v58, 0.0  ;;  %v4010_v16 = vpop.f32.mrb[4].mxu0  ;;  %v3056_v22 = vsel %vm3055_vm9, %v3023_v2, 0.0 }
 0x200   : > { %v4062_v51 = vadd.f32 %v4010_v16, %v3840_v62  ;;  %v2841_v48 = vpop.f32.mrb[5].mxu0  ;;  %v3061_v19 = vsel %vm3055_vm9, %v3026_v12, 0.0 }
 0x201   : > { %v3057_v33 = vsel %vm3055_vm9, %v3024_v20, 0.0  ;;  %v4063_v9 = vadd.f32 %v2841_v48, %v1765_v35  ;;  %v4011_v39 = vpop.f32.mrb[6].mxu0 }
 0x202   : > { %v3058_v43 = vadd.f32 %v3057_v33, %v3056_v22  ;;  %v4064_v23 = vadd.f32 %v4011_v39, %v3841_v18  ;;  %v2844_v13 = vpop.f32.mrb[7].mxu0  ;;  %v2997_v10 = vadd.f32 %v4062_v51, %v5547_v52 }
 0x203   : > { %v2995_v24 = vadd.f32 %v4063_v9, %v5547_v52  ;;  %v4065_v34 = vadd.f32 %v2844_v13, %v1768_v53 }
 0x204   : > { %v3060_v54 = vadd.f32 %v3059_v29, %v3058_v43  ;;  %v2998_v56 = vadd.f32 %v4064_v23, %v5547_v52  ;;  %v3029_v25 = vmax.f32 %v2997_v10, 0.0 }
 0x205   : > { %v3027_v63 = vmax.f32 %v2995_v24, 0.0  ;;  %v2996_v40 = vadd.f32 %v4065_v34, %v5547_v52 }
 0x206   : > { %v3062_v5 = vadd.f32 %v3061_v19, %v3060_v54  ;;  %v3030_v53 = vmax.f32 %v2998_v56, 0.0  ;;  %v3067_v32 = vsel %vm3055_vm9, %v3029_v25, 0.0 }
 0x207   : > { %v3063_v46 = vsel %vm3055_vm9, %v3027_v63, 0.0  ;;  %v3028_v6 = vmax.f32 %v2996_v40, 0.0  ;;  %v4014_v57 = vpop.f32.mrb[8].mxu0 }
 0x208   : > { %v5562_v27 = vpop.f32.mrb[24].mxu1  ;;  %v3064_v31 = vadd.f32 %v3063_v46, %v3062_v5  ;;  %v4066_v62 = vadd.f32 %v4014_v57, %v3844_v45  ;;  %v2857_v18 = vpop.f32.mrb[9].mxu0 }
 0x209   : > { %v5564_v35 = vpop.f32.mrb[25].mxu1  ;;  %v3065_v59 = vsel %vm3055_vm9, %v3028_v6, 0.0  ;;  %v4067_v0 = vadd.f32 %v2857_v18, %v5514_v44  ;;  %v4015_v14 = vpop.f32.mrb[10].mxu0  ;;  %v3069_v44 = vsel %vm3055_vm9, %v3030_v53, 0.0 }
 0x20a   : > { %v5568_v8 = vpop.f32.mrb[26].mxu1  ;;  %v3066_v28 = vadd.f32 %v3065_v59, %v3064_v31  ;;  %v4068_v3 = vadd.f32 %v4015_v14, %v5516_v26  ;;  %v2860_v38 = vpop.f32.mrb[11].mxu0  ;;  %v3001_v45 = vadd.f32 %v4066_v62, %v5547_v52 }
 0x20b   : > { %v5571_v41 = vpop.f32.mrb[27].mxu1  ;;  %v2999_v55 = vadd.f32 %v4067_v0, %v5547_v52  ;;  %v4069_v2 = vadd.f32 %v2860_v38, %v5518_v21 }
 0x20c   : > { %v3068_v60 = vadd.f32 %v3067_v32, %v3066_v28  ;;  %v3002_v11 = vadd.f32 %v4068_v3, %v5547_v52  ;;  %v3033_v16 = vmax.f32 %v3001_v45, 0.0 }
 0x20d   : > { %v3031_v58 = vmax.f32 %v2999_v55, 0.0  ;;  %v3000_v20 = vadd.f32 %v4069_v2, %v5547_v52 }
 0x20e   : > { %v3070_v26 = vadd.f32 %v3069_v44, %v3068_v60  ;;  %v3034_v43 = vmax.f32 %v3002_v11, 0.0  ;;  %v3075_v63 = vsel %vm3055_vm9, %v3033_v16, 0.0 }
 0x20f   : > { %v3071_v51 = vsel %vm3055_vm9, %v3031_v58, 0.0  ;;  %v3032_v48 = vmax.f32 %v3000_v20, 0.0  ;;  %v4018_v12 = vpop.f32.mrb[12].mxu0 }
 0x210   : > { %v5581_v22 = vpop.f32.mrb[28].mxu1  ;;  %v3072_v33 = vadd.f32 %v3071_v51, %v3070_v26  ;;  %v4070_v9 = vadd.f32 %v4018_v12, %v5520_v1  ;;  %v2873_v39 = vpop.f32.mrb[13].mxu0 }
 0x211   : > { %v5584_v21 = vpop.f32.mrb[29].mxu1  ;;  %v3073_v23 = vsel %vm3055_vm9, %v3032_v48, 0.0  ;;  %v4071_v13 = vadd.f32 %v2873_v39, %v5522_v30  ;;  %v4019_v10 = vpop.f32.mrb[14].mxu0  ;;  %v3077_v30 = vsel %vm3055_vm9, %v3034_v43, 0.0 }
 0x212   : > { %v5588_v29 = vpop.f32.mrb[30].mxu1  ;;  %v3074_v24 = vadd.f32 %v3073_v23, %v3072_v33  ;;  %v4072_v34 = vadd.f32 %v4019_v10, %v5524_v61  ;;  %v2876_v19 = vpop.f32.mrb[15].mxu0  ;;  %v3005_v1 = vadd.f32 %v4070_v9, %v5547_v52 }
 0x213   : > { %v5591_v54 = vpop.f32.mrb[31].mxu1  ;;  %v3003_v56 = vadd.f32 %v4071_v13, %v5547_v52  ;;  %v4073_v40 = vadd.f32 %v2876_v19, %v5526_v37 }
 0x214   : > { %v3076_v5 = vadd.f32 %v3075_v63, %v3074_v24  ;;  %v3006_v46 = vadd.f32 %v4072_v34, %v5547_v52  ;;  %v3037_v57 = vmax.f32 %v3005_v1, 0.0 }
 0x215   : > { %v3035_v25 = vmax.f32 %v3003_v56, 0.0  ;;  %v3004_v6 = vadd.f32 %v4073_v40, %v5547_v52 }
 0x216   : > { %v3078_v61 = vadd.f32 %v3077_v30, %v3076_v5  ;;  %v3038_v14 = vmax.f32 %v3006_v46, 0.0  ;;  %v3083_v55 = vsel %vm3055_vm9, %v3037_v57, 0.0 }
 0x217   : > { %v3079_v31 = vsel %vm3055_vm9, %v3035_v25, 0.0  ;;  %v3036_v62 = vmax.f32 %v3004_v6, 0.0  ;;  %v4022_v18 = vpop.f32.mrb[16].mxu0 }
 0x218   : > { %v3080_v53 = vadd.f32 %v3079_v31, %v3078_v61  ;;  %v4074_v59 = vadd.f32 %v4022_v18, %v5528_v36  ;;  %v2889_v0 = vpop.f32.mrb[17].mxu0  ;;  %v3085_v58 = vsel %vm3055_vm9, %v3038_v14, 0.0 }
 0x219   : > { %v3081_v37 = vsel %vm3055_vm9, %v3036_v62, 0.0  ;;  %v4075_v28 = vadd.f32 %v2889_v0, %v5530_v42  ;;  %v4023_v3 = vpop.f32.mrb[18].mxu0 }
 0x21a   : > { %v3082_v38 = vadd.f32 %v3081_v37, %v3080_v53  ;;  %v4076_v32 = vadd.f32 %v4023_v3, %v5532_v50  ;;  %v2892_v45 = vpop.f32.mrb[19].mxu0  ;;  %v3009_v2 = vadd.f32 %v4074_v59, %v5547_v52 }
 0x21b   : > { %v3007_v60 = vadd.f32 %v4075_v28, %v5547_v52  ;;  %v4077_v44 = vadd.f32 %v2892_v45, %v5534_v7 }
 0x21c   : > { %v3084_v36 = vadd.f32 %v3083_v55, %v3082_v38  ;;  %v3010_v20 = vadd.f32 %v4076_v32, %v5547_v52  ;;  %v3041_v16 = vmax.f32 %v3009_v2, 0.0 }
 0x21d   : > { %v3039_v11 = vmax.f32 %v3007_v60, 0.0  ;;  %v3008_v42 = vadd.f32 %v4077_v44, %v5547_v52 }
 0x21e   : > { %v3086_v26 = vadd.f32 %v3085_v58, %v3084_v36  ;;  %v3042_v39 = vmax.f32 %v3010_v20, 0.0  ;;  %v3091_v34 = vsel %vm3055_vm9, %v3041_v16, 0.0 }
 0x21f   : > { %v3087_v50 = vsel %vm3055_vm9, %v3039_v11, 0.0  ;;  %v3040_v51 = vmax.f32 %v3008_v42, 0.0  ;;  %v4026_v48 = vpop.f32.mrb[20].mxu0 }
 0x220   : > { %v3088_v12 = vadd.f32 %v3087_v50, %v3086_v26  ;;  %v4078_v33 = vadd.f32 %v4026_v48, %v5536_v47  ;;  %v2905_v9 = vpop.f32.mrb[21].mxu0  ;;  %v3093_v56 = vsel %vm3055_vm9, %v3042_v39, 0.0 }
 0x221   : > { %v3089_v7 = vsel %vm3055_vm9, %v3040_v51, 0.0  ;;  %v4079_v43 = vadd.f32 %v2905_v9, %v5538_v15  ;;  %v4027_v23 = vpop.f32.mrb[22].mxu0 }
 0x222   : > { %v3090_v13 = vadd.f32 %v3089_v7, %v3088_v12  ;;  %v4080_v10 = vadd.f32 %v4027_v23, %v5540_v49  ;;  %v2908_v24 = vpop.f32.mrb[23].mxu0  ;;  %v3013_v19 = vadd.f32 %v4078_v33, %v5547_v52 }
 0x223   : > { %v3011_v63 = vadd.f32 %v4079_v43, %v5547_v52  ;;  %v4081_v1 = vadd.f32 %v2908_v24, %v5542_v4 }
 0x224   : > { %v3092_v47 = vadd.f32 %v3091_v34, %v3090_v13  ;;  %v3014_v5 = vadd.f32 %v4080_v10, %v5547_v52  ;;  %v3045_v25 = vmax.f32 %v3013_v19, 0.0 }
 0x225   : > { %v3043_v40 = vmax.f32 %v3011_v63, 0.0  ;;  %v3012_v15 = vadd.f32 %v4081_v1, %v5547_v52 }
 0x226   : > { %v3094_v30 = vadd.f32 %v3093_v56, %v3092_v47  ;;  %v3046_v62 = vmax.f32 %v3014_v5, 0.0  ;;  %v3099_v37 = vsel %vm3055_vm9, %v3045_v25, 0.0 }
 0x227   : > { %v3095_v49 = vsel %vm3055_vm9, %v3043_v40, 0.0  ;;  %v3044_v46 = vmax.f32 %v3012_v15, 0.0  ;;  %v4030_v6 = vpop.f32.mrb[24].mxu0 }
 0x228   : > { %v3096_v61 = vadd.f32 %v3095_v49, %v3094_v30  ;;  %v4082_v57 = vadd.f32 %v4030_v6, %v5562_v27  ;;  %v2921_v31 = vpop.f32.mrb[25].mxu0  ;;  %v3101_v32 = vsel %vm3055_vm9, %v3046_v62, 0.0  ;;  %v4386_v6 = vld [vmem:[%s5728_s5] sm:$0xff]   ;;  %v4389_v62 = vld [vmem:[%s5728_s5 + $0x18] sm:$0xff]  }
 0x229   : > { %v3097_v4 = vsel %vm3055_vm9, %v3044_v46, 0.0  ;;  %v4083_v18 = vadd.f32 %v2921_v31, %v5564_v35  ;;  %v4031_v53 = vpop.f32.mrb[26].mxu0  ;;  %v4388_v31 = vld [vmem:[%s5728_s5 + $0x10] sm:$0xff]  }
 0x22a   : > { %v3098_v59 = vadd.f32 %v3097_v4, %v3096_v61  ;;  %v4084_v0 = vadd.f32 %v4031_v53, %v5568_v8  ;;  %v2924_v14 = vpop.f32.mrb[27].mxu0  ;;  %v3017_v28 = vadd.f32 %v4082_v57, %v5547_v52  ;;  %v4387_v57 = vld [vmem:[%s5728_s5 + $0x8] sm:$0xff]   ;;  %v3132_v4 = vld [vmem:[%s5727_s4] sm:$0x1] }
 0x22b   : > { %v3015_v3 = vadd.f32 %v4083_v18, %v5547_v52  ;;  %v4085_v38 = vadd.f32 %v2924_v14, %v5571_v41 }
 0x22c   : > { %v3100_v27 = vadd.f32 %v3099_v37, %v3098_v59  ;;  %v3018_v55 = vadd.f32 %v4084_v0, %v5547_v52  ;;  %v3049_v60 = vmax.f32 %v3017_v28, 0.0 }
 0x22d   : > { %v3047_v45 = vmax.f32 %v3015_v3, 0.0  ;;  %v3016_v35 = vadd.f32 %v4085_v38, %v5547_v52 }
 0x22e   : > { %v3102_v2 = vadd.f32 %v3101_v32, %v3100_v27  ;;  %v3050_v42 = vmax.f32 %v3018_v55, 0.0  ;;  %v3107_v12 = vsel %vm3055_vm9, %v3049_v60, 0.0 }
 0x22f   : > { %v3103_v8 = vsel %vm3055_vm9, %v3047_v45, 0.0  ;;  %v3048_v44 = vmax.f32 %v3016_v35, 0.0  ;;  %v4034_v36 = vpop.f32.mrb[28].mxu0 }
 0x230   : > { %v3104_v58 = vadd.f32 %v3103_v8, %v3102_v2  ;;  %v4086_v11 = vadd.f32 %v4034_v36, %v5581_v22  ;;  %v2937_v20 = vpop.f32.mrb[29].mxu0  ;;  %v3109_v7 = vsel %vm3055_vm9, %v3050_v42, 0.0 }
 0x231   : > { %v3105_v41 = vsel %vm3055_vm9, %v3048_v44, 0.0  ;;  %v4087_v26 = vadd.f32 %v2937_v20, %v5584_v21  ;;  %v4035_v16 = vpop.f32.mrb[30].mxu0 }
 0x232   : > { %v3106_v50 = vadd.f32 %v3105_v41, %v3104_v58  ;;  %v4088_v51 = vadd.f32 %v4035_v16, %v5588_v29  ;;  %v2940_v48 = vpop.f32.mrb[31].mxu0  ;;  %v3021_v33 = vadd.f32 %v4086_v11, %v5547_v52 }
 0x233   : > { %v3019_v9 = vadd.f32 %v4087_v26, %v5547_v52  ;;  %v4089_v39 = vadd.f32 %v2940_v48, %v5591_v54 }
 0x234   : > { %v3108_v22 = vadd.f32 %v3107_v12, %v3106_v50  ;;  %v3022_v23 = vadd.f32 %v4088_v51, %v5547_v52  ;;  %v3053_v10 = vmax.f32 %v3021_v33, 0.0 }
 0x235   : > { %v3051_v43 = vmax.f32 %v3019_v9, 0.0  ;;  %v3020_v21 = vadd.f32 %v4089_v39, %v5547_v52 }
 0x236   : > { %v3110_v13 = vadd.f32 %v3109_v7, %v3108_v22  ;;  %v3054_v19 = vmax.f32 %v3022_v23, 0.0  ;;  %v3115_v54 = vsel %vm3055_vm9, %v3053_v10, 0.0 }
 0x237   : > { %v3111_v29 = vsel %vm3055_vm9, %v3051_v43, 0.0  ;;  %v3052_v24 = vmax.f32 %v3020_v21, 0.0 }
 0x238   : > { %v3112_v34 = vadd.f32 %v3111_v29, %v3110_v13  ;;  %v3117_v56 = vsel %vm3055_vm9, %v3054_v19, 0.0 }
 0x239   : > { %v3113_v63 = vsel %vm3055_vm9, %v3052_v24, 0.0 }
 0x23a   : > { %v3114_v1 = vadd.f32 %v3113_v63, %v3112_v34 }
 0x23c   : > { %v3116_v47 = vadd.f32 %v3115_v54, %v3114_v1 }
 0x23e   : > { %v3118_v40 = vadd.f32 %v3117_v56, %v3116_v47 }
 0x240   : > { %v3119_v5 = vrot.slane %v3118_v40, 4 }
 0x242   : > { %v3120_v15 = vadd.f32 %v3119_v5, %v3118_v40 }
 0x244   : > { %v3121_v30 = vrot.slane %v3120_v15, 2 }
 0x246   : > { %v3122_v52 = vadd.f32 %v3121_v30, %v3120_v15 }
 0x248   : > { %v3123_v25 = vrot.slane %v3122_v52, 1 }
 0x24a   : > { %v3124_v49 = vadd.f32 %v3123_v25, %v3122_v52 }
 0x24c   : > { %v3126_v46 = vmul.f32 0.00390625, %v3124_v49 }
 0x24e   : > { %v3127_v61 = vpack.c.bf16 %v3126_v46, %v3126_v46 }
 0x250   : > { %4041 = vmatmul.mubr.msk.bf16.vlgmr.msra.gmra.mrb[32].mxu1 %vm3055_vm9, %v3127_v61 }
 0x251   : > { %4045 = vmatpush3.bf16.msra.mxu1 %v4386_v6  ;;  %4052 = vmatprep.mubr.msk.bf16.mxu1 %vm4459_vm8, %v4458_v17 }
 0x252   : > { %4046 = vmatprep.subr.bf16.mxu1 %v4458_v17 }
 0x255   : > { %4047 = vmatpush3.bf16.msra.mxu1 %v4387_v57 }
 0x256   : > { %4048 = vmatprep.subr.bf16.mxu1 %v4458_v17 }
 0x259   : > { %4049 = vmatpush3.bf16.msra.mxu1 %v4388_v31 }
 0x25a   : > { %4050 = vmatprep.subr.bf16.mxu1 %v4458_v17  ;;  %v3198_v17 = vld [vmem:[%s5729_s6] sm:$0x1] }
 0x25d   : > { %4051 = vmatpush3.bf16.msra.mxu1 %v4389_v62 }
 0x323   : > { %v3182_v18 = vpop.f32.mrb[32].mxu1 }
 0x324   : > { %v3183_v53 = vadd.f32 %v3182_v18, %v3132_v4  ;;  %v4042_v59 = vpop.f32.mrb[33].mxu1 }
 0x325   : > { %v3185_v0 = vpop.f32.mrb[34].mxu1 }
 0x326   : > { %v3188_v14 = vmax.f32 %v3183_v53, 0.0  ;;  %v4043_v37 = vpop.f32.mrb[35].mxu1 }
 0x328   : > { %v3189_v28 = vpack.c.bf16 %v3188_v14, %v3188_v14 }
 0x32a   : > { %4053 = vmatmul.mubr.msk.bf16.vlgmr.msra.gmra.mrb[36].mxu1 %vm3223_vm10, %v3189_v28 }
 0x3fd   : > { %v3261_v3 = vpop.f32.mrb[36].mxu1 }
 0x3fe   : > { %v3262_v38 = vadd.f32 %v3261_v3, %v3198_v17  ;;  %v4054_v27 = vpop.f32.mrb[37].mxu1 }
 0x3ff   : > { %v3264_v32 = vpop.f32.mrb[38].mxu1 }
 0x400   : > { %3267 = vst [vmem:[%s270_s16] sm:$0x1] %v3262_v38  ;;  %v4055_v45 = vpop.f32.mrb[39].mxu1 }
 0x401   : > { %4407 = shalt.err (!%p4404_p3)
}
 0x402   : > { %s4408_s8 = scalar_lea.hbm %s5681_s20, 16  ;;  %s4412_s14 = scalar_lea.hbm %s5730_s7, 32 }
 0x403   : > { %p4409_p4 = scmp.ne.s32.totalorder %s5681_s20, %s4408_s8  ;;  %p4413_p9 = scmp.lt.u32.totalorder %s5681_s20, %s5730_s7 }
 0x404   : > { %p4414_p10 = scmp.lt.u32.totalorder %s4412_s14, %s4408_s8  ;;  %p4416_p12 = scmp.lt.u32.totalorder %s4408_s8, %s5681_s20 }
 0x405   : > { %p4410_p7 = pnand %p4409_p4, %p4539_p5 }
 0x406   : > { %p4415_p11 = por %p4414_p10, %p4413_p9 }
 0x407   : > { %p4411_p8 = pneg %p4410_p7 }
 0x408   : > { %p4417_p13 = por %p4416_p12, %p4415_p11 }
 0x40a   : > { %p4418_p0 = pnand %p4417_p13, %p4411_p8 }
 0x40c   : > { %4421 = shalt.err (!%p4418_p0)
}
 0x40d   : > { %4325 = dma.vmem_to_hbm [thread:$0]  (%p4539_p5), %s5683_s17, 16, %s5681_s20, %s3269_s21  }
 0x40e PF: > { %p4331_p1 = scmp.ge.s32.totalorder %s4456_s27, 2  ;;  %s3293_s18 = sand.u32 1, %s4444_s24  }
 0x40f   : > { %s3294_s19 = scalar_lea.sflag [#allocation3], %s3293_s18 }
 0x410   : > { %p4328_p2 = pnand %p4331_p1, %p4543_p6 }
 0x412   : > { %4439 = dma.done.wait (!%p4328_p2), %s3294_s19, 16  }
 0x413   : > { %4441 = vsyncadd (!%p4328_p2), %s3294_s19, 4294967280  ;;  %p17_p3 = scmp.ge.s32.totalorder %s4526_s30, 4   ;;  %s5805_s24 = smov %s4448_s25 }
 0x414   : > { %s5806_s25 = smov %s4452_s26  ;;  %s5807_s26 = smov %s4537_s10 }
 0x415   : > { %s5808_s27 = smov %s4526_s30  ;;  %19 = sbr.rel (!%p17_p3) target bundleno = 3 (0x3), region = 83 }
 0x41c   :  { %3298 = vsyncpa [#allocation3], 1 }
 0x41d   :  { %3300 = vsyncpa [#allocation3 + $0x1], 1 }

</bundles_post_ra>
